<compile_context>
chip_gen: v6e
topology: v6e:2x2x1
jax: 0.10.0
libtpu: 0.0.40
codegen_flags: <defaults>
</compile_context>

<pallas_src>
import jax
import jax.numpy as jnp
from jax import lax
from jax.experimental import pallas as pl
from jax.experimental.pallas import tpu as pltpu


def gru_chunk_kernel(gir_ref, giz_ref, gin_ref,
                     whr_ref, whz_ref, whn_ref, bhn_ref,
                     out_ref, h_scratch):
    """Runs T_chunk GRU steps per grid iteration.

    gir/giz/gin_ref : (Tc, B, H)  precomputed input-gate pre-activations
                      (r/z already include b_ih + b_hh; n includes b_ih only)
    whr/whz/whn_ref : (H, H)      per-gate hidden->hidden weights (pre-transposed)
    bhn_ref         : (1, H)      hidden bias for the n gate (stays inside r*(...))
    out_ref         : (Tc, B, H)  per-step hidden outputs
    h_scratch       : (B, H) f32  recurrent state, persists across grid steps
    """
    c = pl.program_id(0)

    @pl.when(c == 0)
    def _init():
        h_scratch[...] = jnp.zeros_like(h_scratch)

    tc, b, h_dim = out_ref.shape

    # Hoist weight loads / bias broadcast out of the unrolled time loop
    # (JAX does not CSE broadcast_in_dim).
    whr = whr_ref[...]
    whz = whz_ref[...]
    whn = whn_ref[...]
    bhn = jnp.broadcast_to(bhn_ref[...], (b, h_dim))

    def step(i, h):
        gr = gir_ref[i] + jnp.dot(h, whr, preferred_element_type=jnp.float32)
        gz = giz_ref[i] + jnp.dot(h, whz, preferred_element_type=jnp.float32)
        r = jax.nn.sigmoid(gr)
        z = jax.nn.sigmoid(gz)
        hn = jnp.dot(h, whn, preferred_element_type=jnp.float32) + bhn
        n = jnp.tanh(gin_ref[i] + r * hn)
        h_new = (1.0 - z) * n + z * h
        out_ref[i] = h_new.astype(out_ref.dtype)
        return h_new

    h_final = lax.fori_loop(0, tc, step, h_scratch[...], unroll=True)
    h_scratch[...] = h_final


def gru_pallas(gi_r, gi_z, gi_n, whr_t, whz_t, whn_t, bhn, *, t_chunk=None):
    """Inputs are time-major precomputed gates (T, B, H). Returns out_tbh (T, B, H)."""
    T, B, H = gi_r.shape
    tc = T if t_chunk is None else t_chunk
    assert T % tc == 0, "T must be divisible by t_chunk"
    n_chunks = T // tc

    gate_spec = pl.BlockSpec((tc, B, H), lambda c: (c, 0, 0))
    weight_spec = pl.BlockSpec((H, H), lambda c: (0, 0))

    out_tbh = pl.pallas_call(
        gru_chunk_kernel,
        out_shape=jax.ShapeDtypeStruct((T, B, H), jnp.float32),
        grid_spec=pltpu.PrefetchScalarGridSpec(
            num_scalar_prefetch=0,
            grid=(n_chunks,),
            in_specs=[
                gate_spec,                                   # gi_r
                gate_spec,                                   # gi_z
                gate_spec,                                   # gi_n
                weight_spec,                                 # W_hh_r^T
                weight_spec,                                 # W_hh_z^T
                weight_spec,                                 # W_hh_n^T
                pl.BlockSpec((1, H), lambda c: (0, 0)),      # b_hh_n
            ],
            out_specs=pl.BlockSpec((tc, B, H), lambda c: (c, 0, 0)),
            scratch_shapes=[pltpu.VMEM((B, H), jnp.float32)],
        ),
        compiler_params=pltpu.CompilerParams(
            dimension_semantics=("arbitrary",),   # recurrence -> sequential chunks
        ),
    )(gi_r, gi_z, gi_n, whr_t, whz_t, whn_t, bhn)
    return out_tbh


def encoder_rnn_forward(tokens, params):
    """tokens: (B, T) int32. Returns (output (B,T,H) batch_first, hidden (1,B,H))."""
    emb = params["embedding"]                     # (V, H)
    w_ih, w_hh = params["w_ih"], params["w_hh"]   # (3H, H) each, gate order r,z,n
    b_ih, b_hh = params["b_ih"], params["b_hh"]   # (3H,)
    B, T = tokens.shape
    H = emb.shape[1]

    # Transpose the cheap int32 token matrix so the gather lands time-major directly.
    x_tbh = jnp.take(emb, tokens.T, axis=0)       # (T, B, H)
    # dropout (eval mode): identity.

    # Hoisted input projection: one batched matmul over all timesteps (M = T*B).
    gi = jnp.dot(x_tbh.reshape(T * B, H), w_ih.T,
                 preferred_element_type=jnp.float32) + b_ih        # (T*B, 3H)
    gi = gi.reshape(T, B, 3 * H)
    # Pre-fold hidden biases for r/z gates; keep b_hh_n separate (it sits inside r*(...)).
    gi_r = gi[..., 0 * H:1 * H] + b_hh[0 * H:1 * H]
    gi_z = gi[..., 1 * H:2 * H] + b_hh[1 * H:2 * H]
    gi_n = gi[..., 2 * H:3 * H]
    bhn = b_hh[2 * H:3 * H][None, :]              # (1, H)

    # Per-gate hidden weights, pre-transposed so the serial matmul is h @ W.
    whr_t = w_hh[0 * H:1 * H].T                   # (H, H)
    whz_t = w_hh[1 * H:2 * H].T
    whn_t = w_hh[2 * H:3 * H].T

    out_tbh = gru_pallas(gi_r, gi_z, gi_n, whr_t, whz_t, whn_t, bhn, t_chunk=T)
    output = jnp.transpose(out_tbh, (1, 0, 2))    # (B, T, H), batch_first=True
    hidden = out_tbh[-1:]                         # (1, B, H) == final hidden state
    return output, hidden


def gru_reference(x_bth, w_ih, w_hh, b_ih, b_hh):
    """Pure-JAX reference matching torch.nn.GRU(batch_first=True), h0 = 0."""
    B, T, H = x_bth.shape

    def step(h, x_t):
        gi = x_t @ w_ih.T + b_ih
        gh = h @ w_hh.T + b_hh
        i_r, i_z, i_n = gi[:, :H], gi[:, H:2 * H], gi[:, 2 * H:]
        h_r, h_z, h_n = gh[:, :H], gh[:, H:2 * H], gh[:, 2 * H:]
        r = jax.nn.sigmoid(i_r + h_r)
        z = jax.nn.sigmoid(i_z + h_z)
        n = jnp.tanh(i_n + r * h_n)
        h_new = (1.0 - z) * n + z * h
        return h_new, h_new

    h0 = jnp.zeros((B, H), jnp.float32)
    hN, ys = lax.scan(step, h0, jnp.transpose(x_bth, (1, 0, 2)))
    return jnp.transpose(ys, (1, 0, 2)), hN[None]


if __name__ == "__main__":
    # Small shapes: vocab=16, batch=2, seq=8, hidden=32.
    V, B, T, H = 16, 2, 8, 32
    key = jax.random.PRNGKey(0)
    k_emb, k_wih, k_whh, k_bih, k_bhh, k_tok = jax.random.split(key, 6)

    bound = 1.0 / jnp.sqrt(H)
    params = {
        "embedding": jax.random.normal(k_emb, (V, H), jnp.float32),
        "w_ih": jax.random.uniform(k_wih, (3 * H, H), jnp.float32, -bound, bound),
        "w_hh": jax.random.uniform(k_whh, (3 * H, H), jnp.float32, -bound, bound),
        "b_ih": jax.random.uniform(k_bih, (3 * H,), jnp.float32, -bound, bound),
        "b_hh": jax.random.uniform(k_bhh, (3 * H,), jnp.float32, -bound, bound),
    }
    tokens = jax.random.randint(k_tok, (B, T), 0, V, dtype=jnp.int32)

    output, hidden = encoder_rnn_forward(tokens, params)
    output, hidden = jax.block_until_ready((output, hidden))

    # Cross-check against pure-JAX GRU reference.
    embedded = jnp.take(params["embedding"], tokens, axis=0)
    out_ref, h_ref = gru_reference(
        embedded, params["w_ih"], params["w_hh"], params["b_ih"], params["b_hh"])
    assert output.shape == (B, T, H) and hidden.shape == (1, B, H)
    assert jnp.allclose(output, out_ref, atol=1e-5, rtol=1e-5)
    assert jnp.allclose(hidden, h_ref, atol=1e-5, rtol=1e-5)

    print("KERNEL_OK")
</pallas_src>

<mosaic_0001>
module attributes {stable_mosaic.version = 11 : i64} {
  func.func @gru_chunk_kernel(%arg0: i32, %arg1: memref<8x2x32xf32, #tpu.memory_space<vmem>>, %arg2: memref<8x2x32xf32, #tpu.memory_space<vmem>>, %arg3: memref<8x2x32xf32, #tpu.memory_space<vmem>>, %arg4: memref<32x32xf32, #tpu.memory_space<vmem>>, %arg5: memref<32x32xf32, #tpu.memory_space<vmem>>, %arg6: memref<32x32xf32, #tpu.memory_space<vmem>>, %arg7: memref<1x32xf32, #tpu.memory_space<vmem>>, %arg8: memref<8x2x32xf32, #tpu.memory_space<vmem>>, %arg9: memref<2x32xf32, #tpu.memory_space<vmem>>) attributes {dimension_semantics = [#tpu.dimension_semantics<arbitrary>], iteration_bounds = array<i64: 1>, scalar_prefetch = 0 : i64, scratch_operands = 1 : i64, tpu.core_type = #tpu.core_type<tc>, window_params = [{transform_indices = @transform_0, window_bounds = array<i64: 8, 2, 32>}, {transform_indices = @transform_1, window_bounds = array<i64: 8, 2, 32>}, {transform_indices = @transform_2, window_bounds = array<i64: 8, 2, 32>}, {pipeline_mode = #tpu.pipeline_mode<synchronous>, transform_indices = @transform_3, window_bounds = array<i64: 32, 32>}, {pipeline_mode = #tpu.pipeline_mode<synchronous>, transform_indices = @transform_4, window_bounds = array<i64: 32, 32>}, {pipeline_mode = #tpu.pipeline_mode<synchronous>, transform_indices = @transform_5, window_bounds = array<i64: 32, 32>}, {pipeline_mode = #tpu.pipeline_mode<synchronous>, transform_indices = @transform_6, window_bounds = array<i64: 1, 32>}, {transform_indices = @transform_7, window_bounds = array<i64: 8, 2, 32>}]} {
    %c0_i32 = arith.constant 0 : i32
    %0 = arith.cmpi eq, %arg0, %c0_i32 : i32
    %1 = arith.extui %0 : i1 to i32
    %c0_i32_0 = arith.constant 0 : i32
    %2 = arith.cmpi ne, %1, %c0_i32_0 : i32
    scf.if %2 {
      %cst_124 = arith.constant 0.000000e+00 : f32
      %307 = vector.broadcast %cst_124 : f32 to vector<2x32xf32>
      %c0_125 = arith.constant 0 : index
      %c0_126 = arith.constant 0 : index
      %308 = vector.load %arg9[%c0_125, %c0_126] : memref<2x32xf32, #tpu.memory_space<vmem>>, vector<2x32xf32>
      tpu.vector_store %arg9[%c0_125, %c0_126], %307 {strides = array<i32>} : memref<2x32xf32, #tpu.memory_space<vmem>>, vector<2x32xf32>,
    } else {
    }
    %c0 = arith.constant 0 : index
    %c0_1 = arith.constant 0 : index
    %3 = vector.load %arg4[%c0, %c0_1] : memref<32x32xf32, #tpu.memory_space<vmem>>, vector<32x32xf32>
    %c0_2 = arith.constant 0 : index
    %c0_3 = arith.constant 0 : index
    %4 = vector.load %arg5[%c0_2, %c0_3] : memref<32x32xf32, #tpu.memory_space<vmem>>, vector<32x32xf32>
    %c0_4 = arith.constant 0 : index
    %c0_5 = arith.constant 0 : index
    %5 = vector.load %arg6[%c0_4, %c0_5] : memref<32x32xf32, #tpu.memory_space<vmem>>, vector<32x32xf32>
    %c0_6 = arith.constant 0 : index
    %c0_7 = arith.constant 0 : index
    %6 = vector.load %arg7[%c0_6, %c0_7] : memref<1x32xf32, #tpu.memory_space<vmem>>, vector<1x32xf32>
    %7 = vector.shape_cast %6 : vector<1x32xf32> to vector<1x32xf32>
    %8 = vector.broadcast %7 : vector<1x32xf32> to vector<2x32xf32>
    %c0_8 = arith.constant 0 : index
    %c0_9 = arith.constant 0 : index
    %9 = vector.load %arg9[%c0_8, %c0_9] : memref<2x32xf32, #tpu.memory_space<vmem>>, vector<2x32xf32>
    %c0_i32_10 = arith.constant 0 : i32
    %10 = arith.index_cast %c0_i32_10 : i32 to index
    %c0_11 = arith.constant 0 : index
    %c0_12 = arith.constant 0 : index
    %11 = vector.load %arg1[%10, %c0_11, %c0_12] : memref<8x2x32xf32, #tpu.memory_space<vmem>>, vector<1x2x32xf32>
    %12 = vector.shape_cast %11 : vector<1x2x32xf32> to vector<2x32xf32>
    %cst = arith.constant dense<0.000000e+00> : vector<2x32xf32>
    %13 = tpu.matmul %9, %3, %cst {dimension_numbers = #tpu.dot_dimension_numbers<[1], [0], [0], [1], [0, 0, 1, 1], [], []>} : vector<2x32xf32>, vector<32x32xf32>, vector<2x32xf32> -> vector<2x32xf32>
    %14 = arith.addf %12, %13 : vector<2x32xf32>
    %15 = arith.index_cast %c0_i32_10 : i32 to index
    %c0_13 = arith.constant 0 : index
    %c0_14 = arith.constant 0 : index
    %16 = vector.load %arg2[%15, %c0_13, %c0_14] : memref<8x2x32xf32, #tpu.memory_space<vmem>>, vector<1x2x32xf32>
    %17 = vector.shape_cast %16 : vector<1x2x32xf32> to vector<2x32xf32>
    %cst_15 = arith.constant dense<0.000000e+00> : vector<2x32xf32>
    %18 = tpu.matmul %9, %4, %cst_15 {dimension_numbers = #tpu.dot_dimension_numbers<[1], [0], [0], [1], [0, 0, 1, 1], [], []>} : vector<2x32xf32>, vector<32x32xf32>, vector<2x32xf32> -> vector<2x32xf32>
    %19 = arith.addf %17, %18 : vector<2x32xf32>
    %20 = arith.negf %14 : vector<2x32xf32>
    %21 = math.exp %20 : vector<2x32xf32>
    %cst_16 = arith.constant 1.000000e+00 : f32
    %22 = vector.broadcast %cst_16 : f32 to vector<2x32xf32>
    %23 = arith.addf %22, %21 : vector<2x32xf32>
    %24 = arith.divf %22, %23 : vector<2x32xf32>
    %25 = arith.negf %19 : vector<2x32xf32>
    %26 = math.exp %25 : vector<2x32xf32>
    %cst_17 = arith.constant 1.000000e+00 : f32
    %27 = vector.broadcast %cst_17 : f32 to vector<2x32xf32>
    %28 = arith.addf %27, %26 : vector<2x32xf32>
    %29 = arith.divf %27, %28 : vector<2x32xf32>
    %cst_18 = arith.constant dense<0.000000e+00> : vector<2x32xf32>
    %30 = tpu.matmul %9, %5, %cst_18 {dimension_numbers = #tpu.dot_dimension_numbers<[1], [0], [0], [1], [0, 0, 1, 1], [], []>} : vector<2x32xf32>, vector<32x32xf32>, vector<2x32xf32> -> vector<2x32xf32>
    %31 = arith.addf %30, %8 : vector<2x32xf32>
    %32 = arith.index_cast %c0_i32_10 : i32 to index
    %c0_19 = arith.constant 0 : index
    %c0_20 = arith.constant 0 : index
    %33 = vector.load %arg3[%32, %c0_19, %c0_20] : memref<8x2x32xf32, #tpu.memory_space<vmem>>, vector<1x2x32xf32>
    %34 = vector.shape_cast %33 : vector<1x2x32xf32> to vector<2x32xf32>
    %35 = arith.mulf %24, %31 : vector<2x32xf32>
    %36 = arith.addf %34, %35 : vector<2x32xf32>
    %37 = math.tanh %36 : vector<2x32xf32>
    %cst_21 = arith.constant 1.000000e+00 : f32
    %38 = vector.broadcast %cst_21 : f32 to vector<2x32xf32>
    %39 = arith.subf %38, %29 : vector<2x32xf32>
    %40 = arith.mulf %39, %37 : vector<2x32xf32>
    %41 = arith.mulf %29, %9 : vector<2x32xf32>
    %42 = arith.addf %40, %41 : vector<2x32xf32>
    %43 = arith.index_cast %c0_i32_10 : i32 to index
    %c0_22 = arith.constant 0 : index
    %c0_23 = arith.constant 0 : index
    %44 = vector.load %arg8[%43, %c0_22, %c0_23] : memref<8x2x32xf32, #tpu.memory_space<vmem>>, vector<1x2x32xf32>
    %45 = vector.shape_cast %44 : vector<1x2x32xf32> to vector<2x32xf32>
    %46 = vector.shape_cast %42 : vector<2x32xf32> to vector<1x2x32xf32>
    tpu.vector_store %arg8[%43, %c0_22, %c0_23], %46 {strides = array<i32>} : memref<8x2x32xf32, #tpu.memory_space<vmem>>, vector<1x2x32xf32>,
    %c1_i32 = arith.constant 1 : i32
    %47 = arith.index_cast %c1_i32 : i32 to index
    %c0_24 = arith.constant 0 : index
    %c0_25 = arith.constant 0 : index
    %48 = vector.load %arg1[%47, %c0_24, %c0_25] : memref<8x2x32xf32, #tpu.memory_space<vmem>>, vector<1x2x32xf32>
    %49 = vector.shape_cast %48 : vector<1x2x32xf32> to vector<2x32xf32>
    %cst_26 = arith.constant dense<0.000000e+00> : vector<2x32xf32>
    %50 = tpu.matmul %42, %3, %cst_26 {dimension_numbers = #tpu.dot_dimension_numbers<[1], [0], [0], [1], [0, 0, 1, 1], [], []>} : vector<2x32xf32>, vector<32x32xf32>, vector<2x32xf32> -> vector<2x32xf32>
    %51 = arith.addf %49, %50 : vector<2x32xf32>
    %52 = arith.index_cast %c1_i32 : i32 to index
    %c0_27 = arith.constant 0 : index
    %c0_28 = arith.constant 0 : index
    %53 = vector.load %arg2[%52, %c0_27, %c0_28] : memref<8x2x32xf32, #tpu.memory_space<vmem>>, vector<1x2x32xf32>
    %54 = vector.shape_cast %53 : vector<1x2x32xf32> to vector<2x32xf32>
    %cst_29 = arith.constant dense<0.000000e+00> : vector<2x32xf32>
    %55 = tpu.matmul %42, %4, %cst_29 {dimension_numbers = #tpu.dot_dimension_numbers<[1], [0], [0], [1], [0, 0, 1, 1], [], []>} : vector<2x32xf32>, vector<32x32xf32>, vector<2x32xf32> -> vector<2x32xf32>
    %56 = arith.addf %54, %55 : vector<2x32xf32>
    %57 = arith.negf %51 : vector<2x32xf32>
    %58 = math.exp %57 : vector<2x32xf32>
    %cst_30 = arith.constant 1.000000e+00 : f32
    %59 = vector.broadcast %cst_30 : f32 to vector<2x32xf32>
    %60 = arith.addf %59, %58 : vector<2x32xf32>
    %61 = arith.divf %59, %60 : vector<2x32xf32>
    %62 = arith.negf %56 : vector<2x32xf32>
    %63 = math.exp %62 : vector<2x32xf32>
    %cst_31 = arith.constant 1.000000e+00 : f32
    %64 = vector.broadcast %cst_31 : f32 to vector<2x32xf32>
    %65 = arith.addf %64, %63 : vector<2x32xf32>
    %66 = arith.divf %64, %65 : vector<2x32xf32>
    %cst_32 = arith.constant dense<0.000000e+00> : vector<2x32xf32>
    %67 = tpu.matmul %42, %5, %cst_32 {dimension_numbers = #tpu.dot_dimension_numbers<[1], [0], [0], [1], [0, 0, 1, 1], [], []>} : vector<2x32xf32>, vector<32x32xf32>, vector<2x32xf32> -> vector<2x32xf32>
    %68 = arith.addf %67, %8 : vector<2x32xf32>
    %69 = arith.index_cast %c1_i32 : i32 to index
    %c0_33 = arith.constant 0 : index
    %c0_34 = arith.constant 0 : index
    %70 = vector.load %arg3[%69, %c0_33, %c0_34] : memref<8x2x32xf32, #tpu.memory_space<vmem>>, vector<1x2x32xf32>
    %71 = vector.shape_cast %70 : vector<1x2x32xf32> to vector<2x32xf32>
    %72 = arith.mulf %61, %68 : vector<2x32xf32>
    %73 = arith.addf %71, %72 : vector<2x32xf32>
    %74 = math.tanh %73 : vector<2x32xf32>
    %cst_35 = arith.constant 1.000000e+00 : f32
    %75 = vector.broadcast %cst_35 : f32 to vector<2x32xf32>
    %76 = arith.subf %75, %66 : vector<2x32xf32>
    %77 = arith.mulf %76, %74 : vector<2x32xf32>
    %78 = arith.mulf %66, %42 : vector<2x32xf32>
    %79 = arith.addf %77, %78 : vector<2x32xf32>
    %80 = arith.index_cast %c1_i32 : i32 to index
    %c0_36 = arith.constant 0 : index
    %c0_37 = arith.constant 0 : index
    %81 = vector.load %arg8[%80, %c0_36, %c0_37] : memref<8x2x32xf32, #tpu.memory_space<vmem>>, vector<1x2x32xf32>
    %82 = vector.shape_cast %81 : vector<1x2x32xf32> to vector<2x32xf32>
    %83 = vector.shape_cast %79 : vector<2x32xf32> to vector<1x2x32xf32>
    tpu.vector_store %arg8[%80, %c0_36, %c0_37], %83 {strides = array<i32>} : memref<8x2x32xf32, #tpu.memory_space<vmem>>, vector<1x2x32xf32>,
    %c2_i32 = arith.constant 2 : i32
    %84 = arith.index_cast %c2_i32 : i32 to index
    %c0_38 = arith.constant 0 : index
    %c0_39 = arith.constant 0 : index
    %85 = vector.load %arg1[%84, %c0_38, %c0_39] : memref<8x2x32xf32, #tpu.memory_space<vmem>>, vector<1x2x32xf32>
    %86 = vector.shape_cast %85 : vector<1x2x32xf32> to vector<2x32xf32>
    %cst_40 = arith.constant dense<0.000000e+00> : vector<2x32xf32>
    %87 = tpu.matmul %79, %3, %cst_40 {dimension_numbers = #tpu.dot_dimension_numbers<[1], [0], [0], [1], [0, 0, 1, 1], [], []>} : vector<2x32xf32>, vector<32x32xf32>, vector<2x32xf32> -> vector<2x32xf32>
    %88 = arith.addf %86, %87 : vector<2x32xf32>
    %89 = arith.index_cast %c2_i32 : i32 to index
    %c0_41 = arith.constant 0 : index
    %c0_42 = arith.constant 0 : index
    %90 = vector.load %arg2[%89, %c0_41, %c0_42] : memref<8x2x32xf32, #tpu.memory_space<vmem>>, vector<1x2x32xf32>
    %91 = vector.shape_cast %90 : vector<1x2x32xf32> to vector<2x32xf32>
    %cst_43 = arith.constant dense<0.000000e+00> : vector<2x32xf32>
    %92 = tpu.matmul %79, %4, %cst_43 {dimension_numbers = #tpu.dot_dimension_numbers<[1], [0], [0], [1], [0, 0, 1, 1], [], []>} : vector<2x32xf32>, vector<32x32xf32>, vector<2x32xf32> -> vector<2x32xf32>
    %93 = arith.addf %91, %92 : vector<2x32xf32>
    %94 = arith.negf %88 : vector<2x32xf32>
    %95 = math.exp %94 : vector<2x32xf32>
    %cst_44 = arith.constant 1.000000e+00 : f32
    %96 = vector.broadcast %cst_44 : f32 to vector<2x32xf32>
    %97 = arith.addf %96, %95 : vector<2x32xf32>
    %98 = arith.divf %96, %97 : vector<2x32xf32>
    %99 = arith.negf %93 : vector<2x32xf32>
    %100 = math.exp %99 : vector<2x32xf32>
    %cst_45 = arith.constant 1.000000e+00 : f32
    %101 = vector.broadcast %cst_45 : f32 to vector<2x32xf32>
    %102 = arith.addf %101, %100 : vector<2x32xf32>
    %103 = arith.divf %101, %102 : vector<2x32xf32>
    %cst_46 = arith.constant dense<0.000000e+00> : vector<2x32xf32>
    %104 = tpu.matmul %79, %5, %cst_46 {dimension_numbers = #tpu.dot_dimension_numbers<[1], [0], [0], [1], [0, 0, 1, 1], [], []>} : vector<2x32xf32>, vector<32x32xf32>, vector<2x32xf32> -> vector<2x32xf32>
    %105 = arith.addf %104, %8 : vector<2x32xf32>
    %106 = arith.index_cast %c2_i32 : i32 to index
    %c0_47 = arith.constant 0 : index
    %c0_48 = arith.constant 0 : index
    %107 = vector.load %arg3[%106, %c0_47, %c0_48] : memref<8x2x32xf32, #tpu.memory_space<vmem>>, vector<1x2x32xf32>
    %108 = vector.shape_cast %107 : vector<1x2x32xf32> to vector<2x32xf32>
    %109 = arith.mulf %98, %105 : vector<2x32xf32>
    %110 = arith.addf %108, %109 : vector<2x32xf32>
    %111 = math.tanh %110 : vector<2x32xf32>
    %cst_49 = arith.constant 1.000000e+00 : f32
    %112 = vector.broadcast %cst_49 : f32 to vector<2x32xf32>
    %113 = arith.subf %112, %103 : vector<2x32xf32>
    %114 = arith.mulf %113, %111 : vector<2x32xf32>
    %115 = arith.mulf %103, %79 : vector<2x32xf32>
    %116 = arith.addf %114, %115 : vector<2x32xf32>
    %117 = arith.index_cast %c2_i32 : i32 to index
    %c0_50 = arith.constant 0 : index
    %c0_51 = arith.constant 0 : index
    %118 = vector.load %arg8[%117, %c0_50, %c0_51] : memref<8x2x32xf32, #tpu.memory_space<vmem>>, vector<1x2x32xf32>
    %119 = vector.shape_cast %118 : vector<1x2x32xf32> to vector<2x32xf32>
    %120 = vector.shape_cast %116 : vector<2x32xf32> to vector<1x2x32xf32>
    tpu.vector_store %arg8[%117, %c0_50, %c0_51], %120 {strides = array<i32>} : memref<8x2x32xf32, #tpu.memory_space<vmem>>, vector<1x2x32xf32>,
    %c3_i32 = arith.constant 3 : i32
    %121 = arith.index_cast %c3_i32 : i32 to index
    %c0_52 = arith.constant 0 : index
    %c0_53 = arith.constant 0 : index
    %122 = vector.load %arg1[%121, %c0_52, %c0_53] : memref<8x2x32xf32, #tpu.memory_space<vmem>>, vector<1x2x32xf32>
    %123 = vector.shape_cast %122 : vector<1x2x32xf32> to vector<2x32xf32>
    %cst_54 = arith.constant dense<0.000000e+00> : vector<2x32xf32>
    %124 = tpu.matmul %116, %3, %cst_54 {dimension_numbers = #tpu.dot_dimension_numbers<[1], [0], [0], [1], [0, 0, 1, 1], [], []>} : vector<2x32xf32>, vector<32x32xf32>, vector<2x32xf32> -> vector<2x32xf32>
    %125 = arith.addf %123, %124 : vector<2x32xf32>
    %126 = arith.index_cast %c3_i32 : i32 to index
    %c0_55 = arith.constant 0 : index
    %c0_56 = arith.constant 0 : index
    %127 = vector.load %arg2[%126, %c0_55, %c0_56] : memref<8x2x32xf32, #tpu.memory_space<vmem>>, vector<1x2x32xf32>
    %128 = vector.shape_cast %127 : vector<1x2x32xf32> to vector<2x32xf32>
    %cst_57 = arith.constant dense<0.000000e+00> : vector<2x32xf32>
    %129 = tpu.matmul %116, %4, %cst_57 {dimension_numbers = #tpu.dot_dimension_numbers<[1], [0], [0], [1], [0, 0, 1, 1], [], []>} : vector<2x32xf32>, vector<32x32xf32>, vector<2x32xf32> -> vector<2x32xf32>
    %130 = arith.addf %128, %129 : vector<2x32xf32>
    %131 = arith.negf %125 : vector<2x32xf32>
    %132 = math.exp %131 : vector<2x32xf32>
    %cst_58 = arith.constant 1.000000e+00 : f32
    %133 = vector.broadcast %cst_58 : f32 to vector<2x32xf32>
    %134 = arith.addf %133, %132 : vector<2x32xf32>
    %135 = arith.divf %133, %134 : vector<2x32xf32>
    %136 = arith.negf %130 : vector<2x32xf32>
    %137 = math.exp %136 : vector<2x32xf32>
    %cst_59 = arith.constant 1.000000e+00 : f32
    %138 = vector.broadcast %cst_59 : f32 to vector<2x32xf32>
    %139 = arith.addf %138, %137 : vector<2x32xf32>
    %140 = arith.divf %138, %139 : vector<2x32xf32>
    %cst_60 = arith.constant dense<0.000000e+00> : vector<2x32xf32>
    %141 = tpu.matmul %116, %5, %cst_60 {dimension_numbers = #tpu.dot_dimension_numbers<[1], [0], [0], [1], [0, 0, 1, 1], [], []>} : vector<2x32xf32>, vector<32x32xf32>, vector<2x32xf32> -> vector<2x32xf32>
    %142 = arith.addf %141, %8 : vector<2x32xf32>
    %143 = arith.index_cast %c3_i32 : i32 to index
    %c0_61 = arith.constant 0 : index
    %c0_62 = arith.constant 0 : index
    %144 = vector.load %arg3[%143, %c0_61, %c0_62] : memref<8x2x32xf32, #tpu.memory_space<vmem>>, vector<1x2x32xf32>
    %145 = vector.shape_cast %144 : vector<1x2x32xf32> to vector<2x32xf32>
    %146 = arith.mulf %135, %142 : vector<2x32xf32>
    %147 = arith.addf %145, %146 : vector<2x32xf32>
    %148 = math.tanh %147 : vector<2x32xf32>
    %cst_63 = arith.constant 1.000000e+00 : f32
    %149 = vector.broadcast %cst_63 : f32 to vector<2x32xf32>
    %150 = arith.subf %149, %140 : vector<2x32xf32>
    %151 = arith.mulf %150, %148 : vector<2x32xf32>
    %152 = arith.mulf %140, %116 : vector<2x32xf32>
    %153 = arith.addf %151, %152 : vector<2x32xf32>
    %154 = arith.index_cast %c3_i32 : i32 to index
    %c0_64 = arith.constant 0 : index
    %c0_65 = arith.constant 0 : index
    %155 = vector.load %arg8[%154, %c0_64, %c0_65] : memref<8x2x32xf32, #tpu.memory_space<vmem>>, vector<1x2x32xf32>
    %156 = vector.shape_cast %155 : vector<1x2x32xf32> to vector<2x32xf32>
    %157 = vector.shape_cast %153 : vector<2x32xf32> to vector<1x2x32xf32>
    tpu.vector_store %arg8[%154, %c0_64, %c0_65], %157 {strides = array<i32>} : memref<8x2x32xf32, #tpu.memory_space<vmem>>, vector<1x2x32xf32>,
    %c4_i32 = arith.constant 4 : i32
    %158 = arith.index_cast %c4_i32 : i32 to index
    %c0_66 = arith.constant 0 : index
    %c0_67 = arith.constant 0 : index
    %159 = vector.load %arg1[%158, %c0_66, %c0_67] : memref<8x2x32xf32, #tpu.memory_space<vmem>>, vector<1x2x32xf32>
    %160 = vector.shape_cast %159 : vector<1x2x32xf32> to vector<2x32xf32>
    %cst_68 = arith.constant dense<0.000000e+00> : vector<2x32xf32>
    %161 = tpu.matmul %153, %3, %cst_68 {dimension_numbers = #tpu.dot_dimension_numbers<[1], [0], [0], [1], [0, 0, 1, 1], [], []>} : vector<2x32xf32>, vector<32x32xf32>, vector<2x32xf32> -> vector<2x32xf32>
    %162 = arith.addf %160, %161 : vector<2x32xf32>
    %163 = arith.index_cast %c4_i32 : i32 to index
    %c0_69 = arith.constant 0 : index
    %c0_70 = arith.constant 0 : index
    %164 = vector.load %arg2[%163, %c0_69, %c0_70] : memref<8x2x32xf32, #tpu.memory_space<vmem>>, vector<1x2x32xf32>
    %165 = vector.shape_cast %164 : vector<1x2x32xf32> to vector<2x32xf32>
    %cst_71 = arith.constant dense<0.000000e+00> : vector<2x32xf32>
    %166 = tpu.matmul %153, %4, %cst_71 {dimension_numbers = #tpu.dot_dimension_numbers<[1], [0], [0], [1], [0, 0, 1, 1], [], []>} : vector<2x32xf32>, vector<32x32xf32>, vector<2x32xf32> -> vector<2x32xf32>
    %167 = arith.addf %165, %166 : vector<2x32xf32>
    %168 = arith.negf %162 : vector<2x32xf32>
    %169 = math.exp %168 : vector<2x32xf32>
    %cst_72 = arith.constant 1.000000e+00 : f32
    %170 = vector.broadcast %cst_72 : f32 to vector<2x32xf32>
    %171 = arith.addf %170, %169 : vector<2x32xf32>
    %172 = arith.divf %170, %171 : vector<2x32xf32>
    %173 = arith.negf %167 : vector<2x32xf32>
    %174 = math.exp %173 : vector<2x32xf32>
    %cst_73 = arith.constant 1.000000e+00 : f32
    %175 = vector.broadcast %cst_73 : f32 to vector<2x32xf32>
    %176 = arith.addf %175, %174 : vector<2x32xf32>
    %177 = arith.divf %175, %176 : vector<2x32xf32>
    %cst_74 = arith.constant dense<0.000000e+00> : vector<2x32xf32>
    %178 = tpu.matmul %153, %5, %cst_74 {dimension_numbers = #tpu.dot_dimension_numbers<[1], [0], [0], [1], [0, 0, 1, 1], [], []>} : vector<2x32xf32>, vector<32x32xf32>, vector<2x32xf32> -> vector<2x32xf32>
    %179 = arith.addf %178, %8 : vector<2x32xf32>
    %180 = arith.index_cast %c4_i32 : i32 to index
    %c0_75 = arith.constant 0 : index
    %c0_76 = arith.constant 0 : index
    %181 = vector.load %arg3[%180, %c0_75, %c0_76] : memref<8x2x32xf32, #tpu.memory_space<vmem>>, vector<1x2x32xf32>
    %182 = vector.shape_cast %181 : vector<1x2x32xf32> to vector<2x32xf32>
    %183 = arith.mulf %172, %179 : vector<2x32xf32>
    %184 = arith.addf %182, %183 : vector<2x32xf32>
    %185 = math.tanh %184 : vector<2x32xf32>
    %cst_77 = arith.constant 1.000000e+00 : f32
    %186 = vector.broadcast %cst_77 : f32 to vector<2x32xf32>
    %187 = arith.subf %186, %177 : vector<2x32xf32>
    %188 = arith.mulf %187, %185 : vector<2x32xf32>
    %189 = arith.mulf %177, %153 : vector<2x32xf32>
    %190 = arith.addf %188, %189 : vector<2x32xf32>
    %191 = arith.index_cast %c4_i32 : i32 to index
    %c0_78 = arith.constant 0 : index
    %c0_79 = arith.constant 0 : index
    %192 = vector.load %arg8[%191, %c0_78, %c0_79] : memref<8x2x32xf32, #tpu.memory_space<vmem>>, vector<1x2x32xf32>
    %193 = vector.shape_cast %192 : vector<1x2x32xf32> to vector<2x32xf32>
    %194 = vector.shape_cast %190 : vector<2x32xf32> to vector<1x2x32xf32>
    tpu.vector_store %arg8[%191, %c0_78, %c0_79], %194 {strides = array<i32>} : memref<8x2x32xf32, #tpu.memory_space<vmem>>, vector<1x2x32xf32>,
    %c5_i32 = arith.constant 5 : i32
    %195 = arith.index_cast %c5_i32 : i32 to index
    %c0_80 = arith.constant 0 : index
    %c0_81 = arith.constant 0 : index
    %196 = vector.load %arg1[%195, %c0_80, %c0_81] : memref<8x2x32xf32, #tpu.memory_space<vmem>>, vector<1x2x32xf32>
    %197 = vector.shape_cast %196 : vector<1x2x32xf32> to vector<2x32xf32>
    %cst_82 = arith.constant dense<0.000000e+00> : vector<2x32xf32>
    %198 = tpu.matmul %190, %3, %cst_82 {dimension_numbers = #tpu.dot_dimension_numbers<[1], [0], [0], [1], [0, 0, 1, 1], [], []>} : vector<2x32xf32>, vector<32x32xf32>, vector<2x32xf32> -> vector<2x32xf32>
    %199 = arith.addf %197, %198 : vector<2x32xf32>
    %200 = arith.index_cast %c5_i32 : i32 to index
    %c0_83 = arith.constant 0 : index
    %c0_84 = arith.constant 0 : index
    %201 = vector.load %arg2[%200, %c0_83, %c0_84] : memref<8x2x32xf32, #tpu.memory_space<vmem>>, vector<1x2x32xf32>
    %202 = vector.shape_cast %201 : vector<1x2x32xf32> to vector<2x32xf32>
    %cst_85 = arith.constant dense<0.000000e+00> : vector<2x32xf32>
    %203 = tpu.matmul %190, %4, %cst_85 {dimension_numbers = #tpu.dot_dimension_numbers<[1], [0], [0], [1], [0, 0, 1, 1], [], []>} : vector<2x32xf32>, vector<32x32xf32>, vector<2x32xf32> -> vector<2x32xf32>
    %204 = arith.addf %202, %203 : vector<2x32xf32>
    %205 = arith.negf %199 : vector<2x32xf32>
    %206 = math.exp %205 : vector<2x32xf32>
    %cst_86 = arith.constant 1.000000e+00 : f32
    %207 = vector.broadcast %cst_86 : f32 to vector<2x32xf32>
    %208 = arith.addf %207, %206 : vector<2x32xf32>
    %209 = arith.divf %207, %208 : vector<2x32xf32>
    %210 = arith.negf %204 : vector<2x32xf32>
    %211 = math.exp %210 : vector<2x32xf32>
    %cst_87 = arith.constant 1.000000e+00 : f32
    %212 = vector.broadcast %cst_87 : f32 to vector<2x32xf32>
    %213 = arith.addf %212, %211 : vector<2x32xf32>
    %214 = arith.divf %212, %213 : vector<2x32xf32>
    %cst_88 = arith.constant dense<0.000000e+00> : vector<2x32xf32>
    %215 = tpu.matmul %190, %5, %cst_88 {dimension_numbers = #tpu.dot_dimension_numbers<[1], [0], [0], [1], [0, 0, 1, 1], [], []>} : vector<2x32xf32>, vector<32x32xf32>, vector<2x32xf32> -> vector<2x32xf32>
    %216 = arith.addf %215, %8 : vector<2x32xf32>
    %217 = arith.index_cast %c5_i32 : i32 to index
    %c0_89 = arith.constant 0 : index
    %c0_90 = arith.constant 0 : index
    %218 = vector.load %arg3[%217, %c0_89, %c0_90] : memref<8x2x32xf32, #tpu.memory_space<vmem>>, vector<1x2x32xf32>
    %219 = vector.shape_cast %218 : vector<1x2x32xf32> to vector<2x32xf32>
    %220 = arith.mulf %209, %216 : vector<2x32xf32>
    %221 = arith.addf %219, %220 : vector<2x32xf32>
    %222 = math.tanh %221 : vector<2x32xf32>
    %cst_91 = arith.constant 1.000000e+00 : f32
    %223 = vector.broadcast %cst_91 : f32 to vector<2x32xf32>
    %224 = arith.subf %223, %214 : vector<2x32xf32>
    %225 = arith.mulf %224, %222 : vector<2x32xf32>
    %226 = arith.mulf %214, %190 : vector<2x32xf32>
    %227 = arith.addf %225, %226 : vector<2x32xf32>
    %228 = arith.index_cast %c5_i32 : i32 to index
    %c0_92 = arith.constant 0 : index
    %c0_93 = arith.constant 0 : index
    %229 = vector.load %arg8[%228, %c0_92, %c0_93] : memref<8x2x32xf32, #tpu.memory_space<vmem>>, vector<1x2x32xf32>
    %230 = vector.shape_cast %229 : vector<1x2x32xf32> to vector<2x32xf32>
    %231 = vector.shape_cast %227 : vector<2x32xf32> to vector<1x2x32xf32>
    tpu.vector_store %arg8[%228, %c0_92, %c0_93], %231 {strides = array<i32>} : memref<8x2x32xf32, #tpu.memory_space<vmem>>, vector<1x2x32xf32>,
    %c6_i32 = arith.constant 6 : i32
    %232 = arith.index_cast %c6_i32 : i32 to index
    %c0_94 = arith.constant 0 : index
    %c0_95 = arith.constant 0 : index
    %233 = vector.load %arg1[%232, %c0_94, %c0_95] : memref<8x2x32xf32, #tpu.memory_space<vmem>>, vector<1x2x32xf32>
    %234 = vector.shape_cast %233 : vector<1x2x32xf32> to vector<2x32xf32>
    %cst_96 = arith.constant dense<0.000000e+00> : vector<2x32xf32>
    %235 = tpu.matmul %227, %3, %cst_96 {dimension_numbers = #tpu.dot_dimension_numbers<[1], [0], [0], [1], [0, 0, 1, 1], [], []>} : vector<2x32xf32>, vector<32x32xf32>, vector<2x32xf32> -> vector<2x32xf32>
    %236 = arith.addf %234, %235 : vector<2x32xf32>
    %237 = arith.index_cast %c6_i32 : i32 to index
    %c0_97 = arith.constant 0 : index
    %c0_98 = arith.constant 0 : index
    %238 = vector.load %arg2[%237, %c0_97, %c0_98] : memref<8x2x32xf32, #tpu.memory_space<vmem>>, vector<1x2x32xf32>
    %239 = vector.shape_cast %238 : vector<1x2x32xf32> to vector<2x32xf32>
    %cst_99 = arith.constant dense<0.000000e+00> : vector<2x32xf32>
    %240 = tpu.matmul %227, %4, %cst_99 {dimension_numbers = #tpu.dot_dimension_numbers<[1], [0], [0], [1], [0, 0, 1, 1], [], []>} : vector<2x32xf32>, vector<32x32xf32>, vector<2x32xf32> -> vector<2x32xf32>
    %241 = arith.addf %239, %240 : vector<2x32xf32>
    %242 = arith.negf %236 : vector<2x32xf32>
    %243 = math.exp %242 : vector<2x32xf32>
    %cst_100 = arith.constant 1.000000e+00 : f32
    %244 = vector.broadcast %cst_100 : f32 to vector<2x32xf32>
    %245 = arith.addf %244, %243 : vector<2x32xf32>
    %246 = arith.divf %244, %245 : vector<2x32xf32>
    %247 = arith.negf %241 : vector<2x32xf32>
    %248 = math.exp %247 : vector<2x32xf32>
    %cst_101 = arith.constant 1.000000e+00 : f32
    %249 = vector.broadcast %cst_101 : f32 to vector<2x32xf32>
    %250 = arith.addf %249, %248 : vector<2x32xf32>
    %251 = arith.divf %249, %250 : vector<2x32xf32>
    %cst_102 = arith.constant dense<0.000000e+00> : vector<2x32xf32>
    %252 = tpu.matmul %227, %5, %cst_102 {dimension_numbers = #tpu.dot_dimension_numbers<[1], [0], [0], [1], [0, 0, 1, 1], [], []>} : vector<2x32xf32>, vector<32x32xf32>, vector<2x32xf32> -> vector<2x32xf32>
    %253 = arith.addf %252, %8 : vector<2x32xf32>
    %254 = arith.index_cast %c6_i32 : i32 to index
    %c0_103 = arith.constant 0 : index
    %c0_104 = arith.constant 0 : index
    %255 = vector.load %arg3[%254, %c0_103, %c0_104] : memref<8x2x32xf32, #tpu.memory_space<vmem>>, vector<1x2x32xf32>
    %256 = vector.shape_cast %255 : vector<1x2x32xf32> to vector<2x32xf32>
    %257 = arith.mulf %246, %253 : vector<2x32xf32>
    %258 = arith.addf %256, %257 : vector<2x32xf32>
    %259 = math.tanh %258 : vector<2x32xf32>
    %cst_105 = arith.constant 1.000000e+00 : f32
    %260 = vector.broadcast %cst_105 : f32 to vector<2x32xf32>
    %261 = arith.subf %260, %251 : vector<2x32xf32>
    %262 = arith.mulf %261, %259 : vector<2x32xf32>
    %263 = arith.mulf %251, %227 : vector<2x32xf32>
    %264 = arith.addf %262, %263 : vector<2x32xf32>
    %265 = arith.index_cast %c6_i32 : i32 to index
    %c0_106 = arith.constant 0 : index
    %c0_107 = arith.constant 0 : index
    %266 = vector.load %arg8[%265, %c0_106, %c0_107] : memref<8x2x32xf32, #tpu.memory_space<vmem>>, vector<1x2x32xf32>
    %267 = vector.shape_cast %266 : vector<1x2x32xf32> to vector<2x32xf32>
    %268 = vector.shape_cast %264 : vector<2x32xf32> to vector<1x2x32xf32>
    tpu.vector_store %arg8[%265, %c0_106, %c0_107], %268 {strides = array<i32>} : memref<8x2x32xf32, #tpu.memory_space<vmem>>, vector<1x2x32xf32>,
    %c7_i32 = arith.constant 7 : i32
    %269 = arith.index_cast %c7_i32 : i32 to index
    %c0_108 = arith.constant 0 : index
    %c0_109 = arith.constant 0 : index
    %270 = vector.load %arg1[%269, %c0_108, %c0_109] : memref<8x2x32xf32, #tpu.memory_space<vmem>>, vector<1x2x32xf32>
    %271 = vector.shape_cast %270 : vector<1x2x32xf32> to vector<2x32xf32>
    %cst_110 = arith.constant dense<0.000000e+00> : vector<2x32xf32>
    %272 = tpu.matmul %264, %3, %cst_110 {dimension_numbers = #tpu.dot_dimension_numbers<[1], [0], [0], [1], [0, 0, 1, 1], [], []>} : vector<2x32xf32>, vector<32x32xf32>, vector<2x32xf32> -> vector<2x32xf32>
    %273 = arith.addf %271, %272 : vector<2x32xf32>
    %274 = arith.index_cast %c7_i32 : i32 to index
    %c0_111 = arith.constant 0 : index
    %c0_112 = arith.constant 0 : index
    %275 = vector.load %arg2[%274, %c0_111, %c0_112] : memref<8x2x32xf32, #tpu.memory_space<vmem>>, vector<1x2x32xf32>
    %276 = vector.shape_cast %275 : vector<1x2x32xf32> to vector<2x32xf32>
    %cst_113 = arith.constant dense<0.000000e+00> : vector<2x32xf32>
    %277 = tpu.matmul %264, %4, %cst_113 {dimension_numbers = #tpu.dot_dimension_numbers<[1], [0], [0], [1], [0, 0, 1, 1], [], []>} : vector<2x32xf32>, vector<32x32xf32>, vector<2x32xf32> -> vector<2x32xf32>
    %278 = arith.addf %276, %277 : vector<2x32xf32>
    %279 = arith.negf %273 : vector<2x32xf32>
    %280 = math.exp %279 : vector<2x32xf32>
    %cst_114 = arith.constant 1.000000e+00 : f32
    %281 = vector.broadcast %cst_114 : f32 to vector<2x32xf32>
    %282 = arith.addf %281, %280 : vector<2x32xf32>
    %283 = arith.divf %281, %282 : vector<2x32xf32>
    %284 = arith.negf %278 : vector<2x32xf32>
    %285 = math.exp %284 : vector<2x32xf32>
    %cst_115 = arith.constant 1.000000e+00 : f32
    %286 = vector.broadcast %cst_115 : f32 to vector<2x32xf32>
    %287 = arith.addf %286, %285 : vector<2x32xf32>
    %288 = arith.divf %286, %287 : vector<2x32xf32>
    %cst_116 = arith.constant dense<0.000000e+00> : vector<2x32xf32>
    %289 = tpu.matmul %264, %5, %cst_116 {dimension_numbers = #tpu.dot_dimension_numbers<[1], [0], [0], [1], [0, 0, 1, 1], [], []>} : vector<2x32xf32>, vector<32x32xf32>, vector<2x32xf32> -> vector<2x32xf32>
    %290 = arith.addf %289, %8 : vector<2x32xf32>
    %291 = arith.index_cast %c7_i32 : i32 to index
    %c0_117 = arith.constant 0 : index
    %c0_118 = arith.constant 0 : index
    %292 = vector.load %arg3[%291, %c0_117, %c0_118] : memref<8x2x32xf32, #tpu.memory_space<vmem>>, vector<1x2x32xf32>
    %293 = vector.shape_cast %292 : vector<1x2x32xf32> to vector<2x32xf32>
    %294 = arith.mulf %283, %290 : vector<2x32xf32>
    %295 = arith.addf %293, %294 : vector<2x32xf32>
    %296 = math.tanh %295 : vector<2x32xf32>
    %cst_119 = arith.constant 1.000000e+00 : f32
    %297 = vector.broadcast %cst_119 : f32 to vector<2x32xf32>
    %298 = arith.subf %297, %288 : vector<2x32xf32>
    %299 = arith.mulf %298, %296 : vector<2x32xf32>
    %300 = arith.mulf %288, %264 : vector<2x32xf32>
    %301 = arith.addf %299, %300 : vector<2x32xf32>
    %302 = arith.index_cast %c7_i32 : i32 to index
    %c0_120 = arith.constant 0 : index
    %c0_121 = arith.constant 0 : index
    %303 = vector.load %arg8[%302, %c0_120, %c0_121] : memref<8x2x32xf32, #tpu.memory_space<vmem>>, vector<1x2x32xf32>
    %304 = vector.shape_cast %303 : vector<1x2x32xf32> to vector<2x32xf32>
    %305 = vector.shape_cast %301 : vector<2x32xf32> to vector<1x2x32xf32>
    tpu.vector_store %arg8[%302, %c0_120, %c0_121], %305 {strides = array<i32>} : memref<8x2x32xf32, #tpu.memory_space<vmem>>, vector<1x2x32xf32>,
    %c8_i32 = arith.constant 8 : i32
    %c0_122 = arith.constant 0 : index
    %c0_123 = arith.constant 0 : index
    %306 = vector.load %arg9[%c0_122, %c0_123] : memref<2x32xf32, #tpu.memory_space<vmem>>, vector<2x32xf32>
    tpu.vector_store %arg9[%c0_122, %c0_123], %301 {strides = array<i32>} : memref<2x32xf32, #tpu.memory_space<vmem>>, vector<2x32xf32>,
    return
  }
  func.func @transform_0(%arg0: i32) -> (i32, i32, i32) {
    %c0_i32 = arith.constant 0 : i32
    %c0_i32_0 = arith.constant 0 : i32
    %c0_i32_1 = arith.constant 0 : i32
    return %arg0, %c0_i32, %c0_i32_0 : i32, i32, i32
  }
  func.func @transform_1(%arg0: i32) -> (i32, i32, i32) {
    %c0_i32 = arith.constant 0 : i32
    %c0_i32_0 = arith.constant 0 : i32
    %c0_i32_1 = arith.constant 0 : i32
    return %arg0, %c0_i32, %c0_i32_0 : i32, i32, i32
  }
  func.func @transform_2(%arg0: i32) -> (i32, i32, i32) {
    %c0_i32 = arith.constant 0 : i32
    %c0_i32_0 = arith.constant 0 : i32
    %c0_i32_1 = arith.constant 0 : i32
    return %arg0, %c0_i32, %c0_i32_0 : i32, i32, i32
  }
  func.func @transform_3(%arg0: i32) -> (i32, i32) {
    %c0_i32 = arith.constant 0 : i32
    %c0_i32_0 = arith.constant 0 : i32
    %c0_i32_1 = arith.constant 0 : i32
    return %c0_i32, %c0_i32_0 : i32, i32
  }
  func.func @transform_4(%arg0: i32) -> (i32, i32) {
    %c0_i32 = arith.constant 0 : i32
    %c0_i32_0 = arith.constant 0 : i32
    %c0_i32_1 = arith.constant 0 : i32
    return %c0_i32, %c0_i32_0 : i32, i32
  }
  func.func @transform_5(%arg0: i32) -> (i32, i32) {
    %c0_i32 = arith.constant 0 : i32
    %c0_i32_0 = arith.constant 0 : i32
    %c0_i32_1 = arith.constant 0 : i32
    return %c0_i32, %c0_i32_0 : i32, i32
  }
  func.func @transform_6(%arg0: i32) -> (i32, i32) {
    %c0_i32 = arith.constant 0 : i32
    %c0_i32_0 = arith.constant 0 : i32
    %c0_i32_1 = arith.constant 0 : i32
    return %c0_i32, %c0_i32_0 : i32, i32
  }
  func.func @transform_7(%arg0: i32) -> (i32, i32, i32) {
    %c0_i32 = arith.constant 0 : i32
    %c0_i32_0 = arith.constant 0 : i32
    %c0_i32_1 = arith.constant 0 : i32
    return %arg0, %c0_i32, %c0_i32_0 : i32, i32, i32
  }
}

</mosaic_0001>

<bundles_post_ra>
// kernel: tpu_custom_call.1
= control target key start
LH: loop header
LB: loop body
LE: loop exit
PB: predicated region body
PF: predicated region fallthrough
CT: control target
= control target key end

     0   :  { %12 = vsyncpa [#allocation4], 0  ;;  %s3171_s0 = inlined_call_operand.hbm [shape: f32[8,2,32], index: 0, kind: input, shape index: {}]   ;;  %s3172_s1 = inlined_call_operand.hbm [shape: f32[8,2,32], index: 1, kind: input, shape index: {}]   ;;  %s3173_s2 = inlined_call_operand.hbm [shape: f32[8,2,32], index: 2, kind: input, shape index: {}]   ;;  %s3174_s3 = inlined_call_operand.hbm [shape: f32[32,32], index: 3, kind: input, shape index: {}]   ;;  %s3175_s4 = inlined_call_operand.hbm [shape: f32[32,32], index: 4, kind: input, shape index: {}]   ;;  %s3176_s5 = inlined_call_operand.hbm [shape: f32[32,32], index: 5, kind: input, shape index: {}]   ;;  %s3177_s6 = inlined_call_operand.vmem [shape: f32[1,32], index: 6, kind: input, shape index: {}]   ;;  %s3178_s7 = inlined_call_operand.hbm [shape: f32[8,2,32], index: 7, kind: output, shape index: {}]  }
   0x1   :  { %13 = vsyncpa [#allocation7], 0 }
   0x2   :  { %14 = vsyncpa [#allocation10], 0 }
   0x3   :  { %15 = vsyncpa [#allocation13], 0 }
   0x4   :  { %16 = vsyncpa [#allocation5], 0  ;;  %s2758_s24 = smov [#allocation6]   ;;  %s2759_s26 = smov [#allocation9]  }
   0x5   :  { %s34_s25 = sshll.u32 %s2758_s24, 4  ;;  %s58_s27 = sshll.u32 %s2759_s26, 4  ;;  %s35_s25 = int_to_ptr.vmem [resolvable:$true] %s34_s25  ;;  %s59_s27 = int_to_ptr.vmem [resolvable:$true] %s58_s27 }
   0x6   :  { %s2616_s28 = scalar_lea.vmem %s35_s25, 256  ;;  %p2621_p1 = scmp.lt.s32.totalorder %s35_s25, %s35_s25 }
   0x7   :  { %p2617_p0 = scmp.ne.s32.totalorder %s35_s25, %s2616_s28  ;;  %p2622_p2 = scmp.lt.s32.totalorder %s2616_s28, %s2616_s28 }
   0x9   :  { %p2623_p3 = por %p2622_p2, %p2621_p1 }
   0xb   :  { %p2624_p4 = pnand %p2623_p3, %p2617_p0 }
   0xd   :  { %2627 = shalt.err (!%p2624_p4)
}
   0xe   :  { %s2760_s29 = smov 32   ;;  %s2761_s30 = smov 2  }
   0xf   :  { %40 = dma.hbm_to_vmem [thread:$0]  %s3172_s1, 256, %s35_s25, [#allocation7], %s2760_s29, %s2760_s29, %s2761_s30  }
  0x10   :  { %s2636_s10 = scalar_lea.vmem %s59_s27, 512  ;;  %p2641_p6 = scmp.lt.s32.totalorder %s59_s27, %s59_s27 }
  0x11   :  { %p2637_p5 = scmp.ne.s32.totalorder %s59_s27, %s2636_s10  ;;  %p2642_p7 = scmp.lt.s32.totalorder %s2636_s10, %s2636_s10 }
  0x13   :  { %p2643_p8 = por %p2642_p7, %p2641_p6 }
  0x15   :  { %p2644_p9 = pnand %p2643_p8, %p2637_p5 }
  0x17   :  { %2647 = shalt.err (!%p2644_p9)
}
  0x18   :  { %s2762_s11 = smov 128   ;;  %s2763_s12 = smov 8  }
  0x19   :  { %64 = dma.hbm_to_vmem [thread:$0]  %s3174_s3, 512, %s59_s27, [#allocation10], %s2762_s11, %s2762_s11, %s2763_s12  }
  0x1a   :  { %s2764_s15 = smov [#allocation3]   ;;  %s2765_s17 = smov [#allocation8]  }
  0x1b   :  { %s22_s16 = sshll.u32 %s2764_s15, 4  ;;  %s46_s1 = sshll.u32 %s2765_s17, 4  ;;  %s23_s16 = int_to_ptr.vmem [resolvable:$true] %s22_s16  ;;  %s47_s1 = int_to_ptr.vmem [resolvable:$true] %s46_s1 }
  0x1c   :  { %s2656_s18 = scalar_lea.vmem %s23_s16, 256  ;;  %p2661_p11 = scmp.lt.s32.totalorder %s23_s16, %s23_s16 }
  0x1d   :  { %p2657_p10 = scmp.ne.s32.totalorder %s23_s16, %s2656_s18  ;;  %p2662_p12 = scmp.lt.s32.totalorder %s2656_s18, %s2656_s18 }
  0x1f   :  { %p2663_p13 = por %p2662_p12, %p2661_p11 }
  0x21   :  { %p2664_p0 = pnand %p2663_p13, %p2657_p10 }
  0x23   :  { %2667 = shalt.err (!%p2664_p0)
}
  0x24   :  { %28 = dma.hbm_to_vmem [thread:$0]  %s3171_s0, 256, %s23_s16, [#allocation4], %s2760_s29, %s2760_s29, %s2761_s30  }
  0x25   :  { %s2676_s3 = scalar_lea.vmem %s47_s1, 256  ;;  %p2681_p2 = scmp.lt.s32.totalorder %s47_s1, %s47_s1 }
  0x26   :  { %p2677_p1 = scmp.ne.s32.totalorder %s47_s1, %s2676_s3  ;;  %p2682_p3 = scmp.lt.s32.totalorder %s2676_s3, %s2676_s3 }
  0x28   :  { %p2683_p4 = por %p2682_p3, %p2681_p2 }
  0x2a   :  { %p2684_p5 = pnand %p2683_p4, %p2677_p1 }
  0x2c   :  { %2687 = shalt.err (!%p2684_p5)
}
  0x2d   :  { %52 = dma.hbm_to_vmem [thread:$0]  %s3173_s2, 256, %s47_s1, [#allocation7], %s2760_s29, %s2760_s29, %s2761_s30  }
  0x2e   :  { %s2766_s23 = smov [#allocation11]   ;;  %s2767_s25 = smov [#allocation12]  }
  0x2f   :  { %s70_s24 = sshll.u32 %s2766_s23, 4  ;;  %s82_s26 = sshll.u32 %s2767_s25, 4  ;;  %s71_s24 = int_to_ptr.vmem [resolvable:$true] %s70_s24  ;;  %s83_s26 = int_to_ptr.vmem [resolvable:$true] %s82_s26 }
  0x30   :  { %s2696_s0 = scalar_lea.vmem %s71_s24, 512  ;;  %p2701_p7 = scmp.lt.s32.totalorder %s71_s24, %s71_s24 }
  0x31   :  { %p2697_p6 = scmp.ne.s32.totalorder %s71_s24, %s2696_s0  ;;  %p2702_p8 = scmp.lt.s32.totalorder %s2696_s0, %s2696_s0 }
  0x33   :  { %p2703_p9 = por %p2702_p8, %p2701_p7 }
  0x35   :  { %p2704_p10 = pnand %p2703_p9, %p2697_p6 }
  0x37   :  { %2707 = shalt.err (!%p2704_p10)
}
  0x38   :  { %76 = dma.hbm_to_vmem [thread:$0]  %s3175_s4, 512, %s71_s24, [#allocation10], %s2762_s11, %s2762_s11, %s2763_s12  }
  0x39   :  { %s2716_s2 = scalar_lea.vmem %s83_s26, 512  ;;  %p2721_p12 = scmp.lt.s32.totalorder %s83_s26, %s83_s26 }
  0x3a   :  { %p2717_p11 = scmp.ne.s32.totalorder %s83_s26, %s2716_s2  ;;  %p2722_p13 = scmp.lt.s32.totalorder %s2716_s2, %s2716_s2 }
  0x3c   :  { %p2723_p0 = por %p2722_p13, %p2721_p12 }
  0x3e   :  { %p2724_p1 = pnand %p2723_p0, %p2717_p11 }
  0x40   :  { %2727 = shalt.err (!%p2724_p1)
}
  0x41   :  { %88 = dma.hbm_to_vmem [thread:$0]  %s3176_s5, 512, %s83_s26, [#allocation13], %s2762_s11, %s2762_s11, %s2763_s12  }
  0x42   :  { %2748 = dma.done.wait [#allocation4], 256  }
  0x43   :  { %2749 = vsyncadd [#allocation4], 4294967040 }
  0x44   :  { %2750 = dma.done.wait [#allocation7], 512  }
  0x45   :  { %2751 = vsyncadd [#allocation7], 4294966784 }
  0x46   :  { %2752 = dma.done.wait [#allocation10], 1024  }
  0x47   :  { %2753 = vsyncadd [#allocation10], 4294966272 }
  0x48   :  { %2754 = dma.done.wait [#allocation13], 512  }
  0x49   :  { %2755 = vsyncadd [#allocation13], 4294966784  ;;  %vm113_vm0 = vcmask 254976   ;;  %v2768_v0 = vmov 0.0   ;;  %vm2769_vm1 = vmmov 0   ;;  %v2855_v1 = vld [vmem:[#allocation9 + $0x18] sm:$0xff] }
  0x4a   :  { %2251 = vmatprep.subr.mxu0 %v2768_v0  ;;  %2259 = vmatprep.mubr.msk.f32.mxu0 %vm2769_vm1, %v2768_v0  ;;  %114 = vst.msk [vmem:[#allocation2] sm:$0x3] %vm113_vm0, %v2768_v0  ;;  %v2857_v2 = vld [vmem:[#allocation9 + $0x10] sm:$0xff]  ;;  %v2860_v3 = vld [vmem:[#allocation11 + $0x18] sm:$0xff]  ;;  %v2863_v4 = vld [vmem:[#allocation9 + $0x8] sm:$0xff]  ;;  %vm136_vm2 = vcmask 261120  }
  0x4b   :  { %2262 = vmatprep.subr.mxu1 %v2768_v0  ;;  %2270 = vmatprep.mubr.msk.f32.mxu1 %vm2769_vm1, %v2768_v0  ;;  %v2866_v5 = vld [vmem:[#allocation11 + $0x10] sm:$0xff]  ;;  %v2870_v6 = vld [vmem:[#allocation11 + $0x8] sm:$0xff]  ;;  %v2873_v7 = vld [vmem:[#allocation9] sm:$0xff] }
  0x4c   :  { %2252 = vmatpush3.msra.mxu0 %v2855_v1  ;;  %2263 = vmatpush3.msra.mxu1 %v2860_v3  ;;  %v2880_v9 = vld [vmem:[#allocation11] sm:$0xff]  ;;  %v2886_v10 = vld [vmem:[#allocation12 + $0x18] sm:$0xff]  ;;  %v2894_v11 = vld [vmem:[#allocation12 + $0x10] sm:$0xff] }
  0x4d   :  { %2253 = vmatprep.subr.mxu0 %v2768_v0  ;;  %2264 = vmatprep.subr.mxu1 %v2768_v0  ;;  %v2900_v12 = vld [vmem:[#allocation12 + $0x8] sm:$0xff]  ;;  %v2906_v13 = vld [vmem:[#allocation12] sm:$0xff]  ;;  %v135_v14 = vld [vmem:[#allocation3] sm:$0x3] }
  0x4e   :  { %2254 = vmatpush3.msra.mxu0 %v2857_v2  ;;  %2265 = vmatpush3.msra.mxu1 %v2866_v5  ;;  %v211_v19 = vld [vmem:[#allocation6] sm:$0x3]  ;;  %v2936_v29 = vld [vmem:[%s3177_s6] ss:$0 sm:$0xff]  ;;  %v365_v33 = vld [vmem:[#allocation8] sm:$0x3] }
  0x4f   :  { %2255 = vmatprep.subr.mxu0 %v2768_v0  ;;  %2266 = vmatprep.subr.mxu1 %v2768_v0  ;;  %v376_v42 = vld [vmem:[#allocation3 + $0x2] sm:$0x3]  ;;  %v452_v49 = vld [vmem:[#allocation6 + $0x2] sm:$0x3]  ;;  %s2770_s6 = smov [#allocation14]  }
  0x50   :  { %2256 = vmatpush3.msra.mxu0 %v2863_v4  ;;  %2267 = vmatpush3.msra.mxu1 %v2870_v6  ;;  %v607_v60 = vld [vmem:[#allocation8 + $0x2] sm:$0x3]  ;;  %s2075_s10 = sshll.u32 %s2770_s6, 4  ;;  %s2076_s10 = int_to_ptr.vmem [resolvable:$true] %s2075_s10 }
  0x51   :  { %v2877_v8 = vld [vmem:[#allocation2] sm:$0x3]  ;;  %2257 = vmatprep.subr.mxu0 %v2768_v0  ;;  %2268 = vmatprep.subr.mxu1 %v2768_v0  ;;  %s2728_s11 = scalar_lea.vmem %s2076_s10, 256  ;;  %p2733_p3 = scmp.lt.s32.totalorder %s2076_s10, %s2076_s10 }
  0x52   :  { %2258 = vmatpush3.msra.mxu0 %v2873_v7  ;;  %2269 = vmatpush3.msra.mxu1 %v2880_v9  ;;  %p2729_p2 = scmp.ne.s32.totalorder %s2076_s10, %s2728_s11  ;;  %p2734_p4 = scmp.lt.s32.totalorder %s2728_s11, %s2728_s11 }
  0x53   :  { %2260 = vmatmul.mubr.msk.f32.vlgmr.msra.gmra.mxu0 %vm136_vm2, %v2877_v8  ;;  %2271 = vmatmul.mubr.msk.f32.vlgmr.msra.gmra.mxu1 %vm136_vm2, %v2877_v8 }
  0x54   :  { %2273 = vmatprep.subr.mxu0 %v2768_v0  ;;  %2281 = vmatprep.mubr.msk.f32.mxu0 %vm2769_vm1, %v2768_v0  ;;  %p2735_p5 = por %p2734_p4, %p2733_p3 }
  0x55   :  { %2274 = vmatpush3.msra.mxu0 %v2886_v10  ;;  %2284 = vmatprep.subr.mxu1 %v2768_v0 }
  0x56   :  { %2275 = vmatprep.subr.mxu0 %v2768_v0  ;;  %2285 = vmatpush3.msra.mxu1 %v2855_v1  ;;  %p2736_p6 = pnand %p2735_p5, %p2729_p2 }
  0x57   :  { %2276 = vmatpush3.msra.mxu0 %v2894_v11  ;;  %2286 = vmatprep.subr.mxu1 %v2768_v0 }
  0x58   :  { %2277 = vmatprep.subr.mxu0 %v2768_v0  ;;  %2287 = vmatpush3.msra.mxu1 %v2857_v2 }
  0x59   :  { %2278 = vmatpush3.msra.mxu0 %v2900_v12  ;;  %2288 = vmatprep.subr.mxu1 %v2768_v0 }
  0x5a   :  { %2279 = vmatprep.subr.mxu0 %v2768_v0  ;;  %2289 = vmatpush3.msra.mxu1 %v2863_v4 }
  0x5b   :  { %2280 = vmatpush3.msra.mxu0 %v2906_v13  ;;  %2290 = vmatprep.subr.mxu1 %v2768_v0 }
  0x5c   :  { %2282 = vmatmul.mubr.msk.f32.vlgmr.msra.gmra.mxu0 %vm136_vm2, %v2877_v8  ;;  %2295 = vmatprep.subr.mxu0 %v2768_v0 }
  0x5d   :  { %2296 = vmatpush3.msra.mxu0 %v2860_v3  ;;  %2291 = vmatpush3.msra.mxu1 %v2873_v7 }
  0x5e   :  { %2297 = vmatprep.subr.mxu0 %v2768_v0  ;;  %2292 = vmatprep.mubr.msk.f32.mxu1 %vm2769_vm1, %v2768_v0 }
  0x5f   :  { %2298 = vmatpush3.msra.mxu0 %v2866_v5  ;;  %2303 = vmatprep.mubr.msk.f32.mxu0 %vm2769_vm1, %v2768_v0 }
  0x60   :  { %2299 = vmatprep.subr.mxu0 %v2768_v0  ;;  %2306 = vmatprep.subr.mxu1 %v2768_v0 }
  0x61   :  { %2300 = vmatpush3.msra.mxu0 %v2870_v6 }
  0x62   :  { %2301 = vmatprep.subr.mxu0 %v2768_v0 }
  0x63   :  { %2302 = vmatpush3.msra.mxu0 %v2880_v9 }
  0x64   :  { %2317 = vmatprep.subr.mxu0 %v2768_v0 }
 0x113   :  { %v206_v15 = vpop.f32.mrf.mxu0  ;;  %v278_v17 = vpop.f32.mrf.mxu1 }
 0x114   :  { %v210_v16 = vadd.f32 %v206_v15, %v135_v14  ;;  %v282_v22 = vadd.f32 %v278_v17, %v211_v19 }
 0x115   :  { %v2261_v18 = vpop.f32.mrf.mxu0  ;;  %v2272_v21 = vpop.f32.mrf.mxu1 }
 0x116   :  { %v2093_v20 = vmul.f32 -1.442695, %v210_v16  ;;  %v2094_v23 = vmul.f32 -1.442695, %v282_v22  ;;  %v618_v18 = vld [vmem:[#allocation3 + $0x4] sm:$0x3] }
 0x118   :  { %2528 = vpow2.f32 %v2093_v20 }
 0x119   :  { %2530 = vpow2.f32 %v2094_v23 }
 0x11c   :  { %v361_v24 = vpop.f32.mrf.mxu0 }
 0x11d   :  { %v362_v31 = vadd.f32 %v2936_v29, %v361_v24 }
 0x11e   :  { %v2283_v25 = vpop.f32.mrf.mxu0 }
 0x11f   :  { %v694_v25 = vld [vmem:[#allocation6 + $0x4] sm:$0x3] }
 0x125   :  { %v2529_v26 = vpop.eup %2528 }
 0x126   :  { %v286_v27 = vadd.f32 1.0, %v2529_v26  ;;  %v2531_v28 = vpop.eup %2530 }
 0x127   :  { %v292_v30 = vadd.f32 1.0, %v2531_v28 }
 0x128   :  { %2532 = vrcp.f32 %v286_v27 }
 0x129   :  { %2534 = vrcp.f32 %v292_v30 }
 0x135   :  { %v2533_v32 = vpop.eup %2532 }
 0x136   :  { %v366_v34 = vmul.f32 %v2533_v32, %v362_v31  ;;  %v2535_v36 = vpop.eup %2534 }
 0x137   :  { %v369_v37 = vsub.f32 1.0, %v2535_v36  ;;  %v371_v40 = vmul.f32 %v2535_v36, %v2877_v8 }
 0x138   :  { %v367_v35 = vadd.f32 %v366_v34, %v365_v33 }
 0x13a   :  { %2536 = vtanh.f32 %v367_v35 }
 0x147   :  { %v2537_v38 = vpop.eup %2536 }
 0x148   :  { %v370_v39 = vmul.f32 %v2537_v38, %v369_v37  ;;  %v849_v37 = vld [vmem:[#allocation8 + $0x4] sm:$0x3] }
 0x14a   :  { %v372_v41 = vadd.f32 %v371_v40, %v370_v39 }
 0x14c   :  { %2293 = vmatmul.mubr.msk.f32.vlgmr.msra.gmra.mxu1 %vm136_vm2, %v372_v41  ;;  %374 = vst.msk [vmem:[#allocation14] sm:$0x3] %vm113_vm0, %v372_v41  ;;  %2304 = vmatmul.mubr.msk.f32.vlgmr.msra.gmra.mxu0 %vm136_vm2, %v372_v41 }
 0x14d   :  { %2307 = vmatpush3.msra.mxu1 %v2886_v10  ;;  %2314 = vmatprep.mubr.msk.f32.mxu1 %vm2769_vm1, %v2768_v0 }
 0x14e   :  { %2308 = vmatprep.subr.mxu1 %v2768_v0  ;;  %2318 = vmatpush3.msra.mxu0 %v2855_v1 }
 0x14f   :  { %2309 = vmatpush3.msra.mxu1 %v2894_v11  ;;  %2319 = vmatprep.subr.mxu0 %v2768_v0 }
 0x150   :  { %2310 = vmatprep.subr.mxu1 %v2768_v0  ;;  %2320 = vmatpush3.msra.mxu0 %v2857_v2 }
 0x151   :  { %2311 = vmatpush3.msra.mxu1 %v2900_v12  ;;  %2321 = vmatprep.subr.mxu0 %v2768_v0 }
 0x152   :  { %2312 = vmatprep.subr.mxu1 %v2768_v0  ;;  %2322 = vmatpush3.msra.mxu0 %v2863_v4 }
 0x153   :  { %2313 = vmatpush3.msra.mxu1 %v2906_v13  ;;  %2323 = vmatprep.subr.mxu0 %v2768_v0 }
 0x154   :  { %2315 = vmatmul.mubr.msk.f32.vlgmr.msra.gmra.mxu1 %vm136_vm2, %v372_v41  ;;  %2328 = vmatprep.subr.mxu1 %v2768_v0 }
 0x155   :  { %2329 = vmatpush3.msra.mxu1 %v2860_v3  ;;  %2324 = vmatpush3.msra.mxu0 %v2873_v7 }
 0x156   :  { %2330 = vmatprep.subr.mxu1 %v2768_v0  ;;  %2325 = vmatprep.mubr.msk.f32.mxu0 %vm2769_vm1, %v2768_v0 }
 0x157   :  { %2331 = vmatpush3.msra.mxu1 %v2866_v5  ;;  %2336 = vmatprep.mubr.msk.f32.mxu1 %vm2769_vm1, %v2768_v0 }
 0x158   :  { %2332 = vmatprep.subr.mxu1 %v2768_v0  ;;  %2339 = vmatprep.subr.mxu0 %v2768_v0 }
 0x159   :  { %2333 = vmatpush3.msra.mxu1 %v2870_v6 }
 0x15a   :  { %2334 = vmatprep.subr.mxu1 %v2768_v0 }
 0x15b   :  { %2335 = vmatpush3.msra.mxu1 %v2880_v9 }
 0x15c   :  { %2350 = vmatprep.subr.mxu1 %v2768_v0 }
 0x20c   :  { %v446_v43 = vpop.f32.mrf.mxu1  ;;  %v519_v44 = vpop.f32.mrf.mxu0 }
 0x20d   :  { %v450_v45 = vadd.f32 %v446_v43, %v376_v42  ;;  %v523_v50 = vadd.f32 %v519_v44, %v452_v49 }
 0x20e   :  { %v2294_v46 = vpop.f32.mrf.mxu1  ;;  %v2305_v47 = vpop.f32.mrf.mxu0 }
 0x20f   :  { %v2098_v48 = vmul.f32 -1.442695, %v450_v45  ;;  %v2099_v53 = vmul.f32 -1.442695, %v523_v50  ;;  %v860_v46 = vld [vmem:[#allocation3 + $0x6] sm:$0x3] }
 0x211   :  { %2538 = vpow2.f32 %v2098_v48 }
 0x212   :  { %2540 = vpow2.f32 %v2099_v53  ;;  %v936_v53 = vld [vmem:[#allocation6 + $0x6] sm:$0x3] }
 0x214   :  { %v602_v51 = vpop.f32.mrf.mxu1 }
 0x215   :  { %v603_v58 = vadd.f32 %v2936_v29, %v602_v51 }
 0x216   :  { %v2316_v52 = vpop.f32.mrf.mxu1 }
 0x21e   :  { %v2539_v54 = vpop.eup %2538 }
 0x21f   :  { %v527_v55 = vadd.f32 1.0, %v2539_v54  ;;  %v2541_v56 = vpop.eup %2540 }
 0x220   :  { %v533_v57 = vadd.f32 1.0, %v2541_v56 }
 0x221   :  { %2542 = vrcp.f32 %v527_v55 }
 0x222   :  { %2544 = vrcp.f32 %v533_v57 }
 0x22e   :  { %v2543_v59 = vpop.eup %2542 }
 0x22f   :  { %v608_v61 = vmul.f32 %v2543_v59, %v603_v58  ;;  %v2545_v63 = vpop.eup %2544 }
 0x230   :  { %v611_v8 = vsub.f32 1.0, %v2545_v63  ;;  %v613_v16 = vmul.f32 %v2545_v63, %v372_v41 }
 0x231   :  { %v609_v62 = vadd.f32 %v608_v61, %v607_v60 }
 0x233   :  { %2546 = vtanh.f32 %v609_v62 }
 0x240   :  { %v2547_v14 = vpop.eup %2546 }
 0x241   :  { %v612_v15 = vmul.f32 %v2547_v14, %v611_v8  ;;  %v1091_v8 = vld [vmem:[#allocation8 + $0x6] sm:$0x3] }
 0x243   :  { %v614_v17 = vadd.f32 %v613_v16, %v612_v15 }
 0x245   :  { %2326 = vmatmul.mubr.msk.f32.vlgmr.msra.gmra.mxu0 %vm136_vm2, %v614_v17  ;;  %616 = vst.msk [vmem:[#allocation14 + $0x2] sm:$0x3] %vm113_vm0, %v614_v17  ;;  %2337 = vmatmul.mubr.msk.f32.vlgmr.msra.gmra.mxu1 %vm136_vm2, %v614_v17 }
 0x246   :  { %2340 = vmatpush3.msra.mxu0 %v2886_v10  ;;  %2347 = vmatprep.mubr.msk.f32.mxu0 %vm2769_vm1, %v2768_v0 }
 0x247   :  { %2341 = vmatprep.subr.mxu0 %v2768_v0  ;;  %2351 = vmatpush3.msra.mxu1 %v2855_v1 }
 0x248   :  { %2342 = vmatpush3.msra.mxu0 %v2894_v11  ;;  %2352 = vmatprep.subr.mxu1 %v2768_v0 }
 0x249   :  { %2343 = vmatprep.subr.mxu0 %v2768_v0  ;;  %2353 = vmatpush3.msra.mxu1 %v2857_v2 }
 0x24a   :  { %2344 = vmatpush3.msra.mxu0 %v2900_v12  ;;  %2354 = vmatprep.subr.mxu1 %v2768_v0 }
 0x24b   :  { %2345 = vmatprep.subr.mxu0 %v2768_v0  ;;  %2355 = vmatpush3.msra.mxu1 %v2863_v4 }
 0x24c   :  { %2346 = vmatpush3.msra.mxu0 %v2906_v13  ;;  %2356 = vmatprep.subr.mxu1 %v2768_v0 }
 0x24d   :  { %2348 = vmatmul.mubr.msk.f32.vlgmr.msra.gmra.mxu0 %vm136_vm2, %v614_v17  ;;  %2361 = vmatprep.subr.mxu0 %v2768_v0 }
 0x24e   :  { %2362 = vmatpush3.msra.mxu0 %v2860_v3  ;;  %2357 = vmatpush3.msra.mxu1 %v2873_v7 }
 0x24f   :  { %2363 = vmatprep.subr.mxu0 %v2768_v0  ;;  %2358 = vmatprep.mubr.msk.f32.mxu1 %vm2769_vm1, %v2768_v0 }
 0x250   :  { %2364 = vmatpush3.msra.mxu0 %v2866_v5  ;;  %2369 = vmatprep.mubr.msk.f32.mxu0 %vm2769_vm1, %v2768_v0 }
 0x251   :  { %2365 = vmatprep.subr.mxu0 %v2768_v0  ;;  %2372 = vmatprep.subr.mxu1 %v2768_v0 }
 0x252   :  { %2366 = vmatpush3.msra.mxu0 %v2870_v6 }
 0x253   :  { %2367 = vmatprep.subr.mxu0 %v2768_v0 }
 0x254   :  { %2368 = vmatpush3.msra.mxu0 %v2880_v9 }
 0x255   :  { %2383 = vmatprep.subr.mxu0 %v2768_v0 }
 0x305   :  { %v688_v19 = vpop.f32.mrf.mxu0  ;;  %v761_v20 = vpop.f32.mrf.mxu1 }
 0x306   :  { %v692_v21 = vadd.f32 %v688_v19, %v618_v18  ;;  %v765_v26 = vadd.f32 %v761_v20, %v694_v25 }
 0x307   :  { %v2327_v22 = vpop.f32.mrf.mxu0  ;;  %v2338_v23 = vpop.f32.mrf.mxu1 }
 0x308   :  { %v2103_v24 = vmul.f32 -1.442695, %v692_v21  ;;  %v2104_v30 = vmul.f32 -1.442695, %v765_v26  ;;  %v1102_v22 = vld [vmem:[#allocation3 + $0x8] sm:$0x3] }
 0x30a   :  { %2548 = vpow2.f32 %v2103_v24 }
 0x30b   :  { %2550 = vpow2.f32 %v2104_v30  ;;  %v1178_v30 = vld [vmem:[#allocation6 + $0x8] sm:$0x3] }
 0x30d   :  { %v844_v27 = vpop.f32.mrf.mxu0 }
 0x30e   :  { %v845_v35 = vadd.f32 %v2936_v29, %v844_v27 }
 0x30f   :  { %v2349_v28 = vpop.f32.mrf.mxu0 }
 0x317   :  { %v2549_v31 = vpop.eup %2548 }
 0x318   :  { %v769_v32 = vadd.f32 1.0, %v2549_v31  ;;  %v2551_v33 = vpop.eup %2550 }
 0x319   :  { %v775_v34 = vadd.f32 1.0, %v2551_v33 }
 0x31a   :  { %2552 = vrcp.f32 %v769_v32 }
 0x31b   :  { %2554 = vrcp.f32 %v775_v34 }
 0x327   :  { %v2553_v36 = vpop.eup %2552 }
 0x328   :  { %v850_v38 = vmul.f32 %v2553_v36, %v845_v35  ;;  %v2555_v40 = vpop.eup %2554 }
 0x329   :  { %v853_v41 = vsub.f32 1.0, %v2555_v40  ;;  %v855_v44 = vmul.f32 %v2555_v40, %v614_v17 }
 0x32a   :  { %v851_v39 = vadd.f32 %v850_v38, %v849_v37 }
 0x32c   :  { %2556 = vtanh.f32 %v851_v39 }
 0x339   :  { %v2557_v42 = vpop.eup %2556 }
 0x33a   :  { %v854_v43 = vmul.f32 %v2557_v42, %v853_v41  ;;  %v1333_v41 = vld [vmem:[#allocation8 + $0x8] sm:$0x3] }
 0x33c   :  { %v856_v45 = vadd.f32 %v855_v44, %v854_v43 }
 0x33e   :  { %2359 = vmatmul.mubr.msk.f32.vlgmr.msra.gmra.mxu1 %vm136_vm2, %v856_v45  ;;  %858 = vst.msk [vmem:[#allocation14 + $0x4] sm:$0x3] %vm113_vm0, %v856_v45  ;;  %2370 = vmatmul.mubr.msk.f32.vlgmr.msra.gmra.mxu0 %vm136_vm2, %v856_v45 }
 0x33f   :  { %2373 = vmatpush3.msra.mxu1 %v2886_v10  ;;  %2380 = vmatprep.mubr.msk.f32.mxu1 %vm2769_vm1, %v2768_v0 }
 0x340   :  { %2374 = vmatprep.subr.mxu1 %v2768_v0  ;;  %2384 = vmatpush3.msra.mxu0 %v2855_v1 }
 0x341   :  { %2375 = vmatpush3.msra.mxu1 %v2894_v11  ;;  %2385 = vmatprep.subr.mxu0 %v2768_v0 }
 0x342   :  { %2376 = vmatprep.subr.mxu1 %v2768_v0  ;;  %2386 = vmatpush3.msra.mxu0 %v2857_v2 }
 0x343   :  { %2377 = vmatpush3.msra.mxu1 %v2900_v12  ;;  %2387 = vmatprep.subr.mxu0 %v2768_v0 }
 0x344   :  { %2378 = vmatprep.subr.mxu1 %v2768_v0  ;;  %2388 = vmatpush3.msra.mxu0 %v2863_v4 }
 0x345   :  { %2379 = vmatpush3.msra.mxu1 %v2906_v13  ;;  %2389 = vmatprep.subr.mxu0 %v2768_v0 }
 0x346   :  { %2381 = vmatmul.mubr.msk.f32.vlgmr.msra.gmra.mxu1 %vm136_vm2, %v856_v45  ;;  %2394 = vmatprep.subr.mxu1 %v2768_v0 }
 0x347   :  { %2395 = vmatpush3.msra.mxu1 %v2860_v3  ;;  %2390 = vmatpush3.msra.mxu0 %v2873_v7 }
 0x348   :  { %2396 = vmatprep.subr.mxu1 %v2768_v0  ;;  %2391 = vmatprep.mubr.msk.f32.mxu0 %vm2769_vm1, %v2768_v0 }
 0x349   :  { %2397 = vmatpush3.msra.mxu1 %v2866_v5  ;;  %2402 = vmatprep.mubr.msk.f32.mxu1 %vm2769_vm1, %v2768_v0 }
 0x34a   :  { %2398 = vmatprep.subr.mxu1 %v2768_v0  ;;  %2405 = vmatprep.subr.mxu0 %v2768_v0 }
 0x34b   :  { %2399 = vmatpush3.msra.mxu1 %v2870_v6 }
 0x34c   :  { %2400 = vmatprep.subr.mxu1 %v2768_v0 }
 0x34d   :  { %2401 = vmatpush3.msra.mxu1 %v2880_v9 }
 0x34e   :  { %2416 = vmatprep.subr.mxu1 %v2768_v0 }
 0x3fe   :  { %v930_v47 = vpop.f32.mrf.mxu1  ;;  %v1003_v48 = vpop.f32.mrf.mxu0 }
 0x3ff   :  { %v934_v49 = vadd.f32 %v930_v47, %v860_v46  ;;  %v1007_v54 = vadd.f32 %v1003_v48, %v936_v53 }
 0x400   :  { %v2360_v50 = vpop.f32.mrf.mxu1  ;;  %v2371_v51 = vpop.f32.mrf.mxu0 }
 0x401   :  { %v2108_v52 = vmul.f32 -1.442695, %v934_v49  ;;  %v2109_v57 = vmul.f32 -1.442695, %v1007_v54  ;;  %v1344_v50 = vld [vmem:[#allocation3 + $0xa] sm:$0x3] }
 0x403   :  { %2558 = vpow2.f32 %v2108_v52 }
 0x404   :  { %2560 = vpow2.f32 %v2109_v57  ;;  %v1420_v57 = vld [vmem:[#allocation6 + $0xa] sm:$0x3] }
 0x406   :  { %v1086_v55 = vpop.f32.mrf.mxu1 }
 0x407   :  { %v1087_v62 = vadd.f32 %v2936_v29, %v1086_v55 }
 0x408   :  { %v2382_v56 = vpop.f32.mrf.mxu1 }
 0x410   :  { %v2559_v58 = vpop.eup %2558 }
 0x411   :  { %v1011_v59 = vadd.f32 1.0, %v2559_v58  ;;  %v2561_v60 = vpop.eup %2560 }
 0x412   :  { %v1017_v61 = vadd.f32 1.0, %v2561_v60 }
 0x413   :  { %2562 = vrcp.f32 %v1011_v59 }
 0x414   :  { %2564 = vrcp.f32 %v1017_v61 }
 0x420   :  { %v2563_v63 = vpop.eup %2562 }
 0x421   :  { %v1092_v14 = vmul.f32 %v2563_v63, %v1087_v62  ;;  %v2565_v16 = vpop.eup %2564 }
 0x422   :  { %v1095_v17 = vsub.f32 1.0, %v2565_v16  ;;  %v1097_v20 = vmul.f32 %v2565_v16, %v856_v45 }
 0x423   :  { %v1093_v15 = vadd.f32 %v1092_v14, %v1091_v8 }
 0x425   :  { %2566 = vtanh.f32 %v1093_v15 }
 0x432   :  { %v2567_v18 = vpop.eup %2566 }
 0x433   :  { %v1096_v19 = vmul.f32 %v2567_v18, %v1095_v17  ;;  %v1575_v17 = vld [vmem:[#allocation8 + $0xa] sm:$0x3] }
 0x435   :  { %v1098_v21 = vadd.f32 %v1097_v20, %v1096_v19 }
 0x437   :  { %2392 = vmatmul.mubr.msk.f32.vlgmr.msra.gmra.mxu0 %vm136_vm2, %v1098_v21  ;;  %1100 = vst.msk [vmem:[#allocation14 + $0x6] sm:$0x3] %vm113_vm0, %v1098_v21  ;;  %2403 = vmatmul.mubr.msk.f32.vlgmr.msra.gmra.mxu1 %vm136_vm2, %v1098_v21 }
 0x438   :  { %2406 = vmatpush3.msra.mxu0 %v2886_v10  ;;  %2413 = vmatprep.mubr.msk.f32.mxu0 %vm2769_vm1, %v2768_v0 }
 0x439   :  { %2407 = vmatprep.subr.mxu0 %v2768_v0  ;;  %2417 = vmatpush3.msra.mxu1 %v2855_v1 }
 0x43a   :  { %2408 = vmatpush3.msra.mxu0 %v2894_v11  ;;  %2418 = vmatprep.subr.mxu1 %v2768_v0 }
 0x43b   :  { %2409 = vmatprep.subr.mxu0 %v2768_v0  ;;  %2419 = vmatpush3.msra.mxu1 %v2857_v2 }
 0x43c   :  { %2410 = vmatpush3.msra.mxu0 %v2900_v12  ;;  %2420 = vmatprep.subr.mxu1 %v2768_v0 }
 0x43d   :  { %2411 = vmatprep.subr.mxu0 %v2768_v0  ;;  %2421 = vmatpush3.msra.mxu1 %v2863_v4 }
 0x43e   :  { %2412 = vmatpush3.msra.mxu0 %v2906_v13  ;;  %2422 = vmatprep.subr.mxu1 %v2768_v0 }
 0x43f   :  { %2414 = vmatmul.mubr.msk.f32.vlgmr.msra.gmra.mxu0 %vm136_vm2, %v1098_v21  ;;  %2427 = vmatprep.subr.mxu0 %v2768_v0 }
 0x440   :  { %2428 = vmatpush3.msra.mxu0 %v2860_v3  ;;  %2423 = vmatpush3.msra.mxu1 %v2873_v7 }
 0x441   :  { %2429 = vmatprep.subr.mxu0 %v2768_v0  ;;  %2424 = vmatprep.mubr.msk.f32.mxu1 %vm2769_vm1, %v2768_v0 }
 0x442   :  { %2430 = vmatpush3.msra.mxu0 %v2866_v5  ;;  %2435 = vmatprep.mubr.msk.f32.mxu0 %vm2769_vm1, %v2768_v0 }
 0x443   :  { %2431 = vmatprep.subr.mxu0 %v2768_v0  ;;  %2438 = vmatprep.subr.mxu1 %v2768_v0 }
 0x444   :  { %2432 = vmatpush3.msra.mxu0 %v2870_v6 }
 0x445   :  { %2433 = vmatprep.subr.mxu0 %v2768_v0 }
 0x446   :  { %2434 = vmatpush3.msra.mxu0 %v2880_v9 }
 0x447   :  { %2449 = vmatprep.subr.mxu0 %v2768_v0 }
 0x4f7   :  { %v1172_v23 = vpop.f32.mrf.mxu0  ;;  %v1245_v24 = vpop.f32.mrf.mxu1 }
 0x4f8   :  { %v1176_v25 = vadd.f32 %v1172_v23, %v1102_v22  ;;  %v1249_v31 = vadd.f32 %v1245_v24, %v1178_v30 }
 0x4f9   :  { %v2393_v26 = vpop.f32.mrf.mxu0  ;;  %v2404_v27 = vpop.f32.mrf.mxu1 }
 0x4fa   :  { %v2113_v28 = vmul.f32 -1.442695, %v1176_v25  ;;  %v2114_v34 = vmul.f32 -1.442695, %v1249_v31  ;;  %v1662_v27 = vld [vmem:[#allocation6 + $0xc] sm:$0x3] }
 0x4fc   :  { %2568 = vpow2.f32 %v2113_v28 }
 0x4fd   :  { %2570 = vpow2.f32 %v2114_v34 }
 0x4ff   :  { %v1328_v32 = vpop.f32.mrf.mxu0 }
 0x500   :  { %v1329_v39 = vadd.f32 %v2936_v29, %v1328_v32 }
 0x501   :  { %v2415_v33 = vpop.f32.mrf.mxu0 }
 0x509   :  { %v2569_v35 = vpop.eup %2568 }
 0x50a   :  { %v1253_v36 = vadd.f32 1.0, %v2569_v35  ;;  %v2571_v37 = vpop.eup %2570 }
 0x50b   :  { %v1259_v38 = vadd.f32 1.0, %v2571_v37  ;;  %v1817_v37 = vld [vmem:[#allocation8 + $0xc] sm:$0x3] }
 0x50c   :  { %2572 = vrcp.f32 %v1253_v36 }
 0x50d   :  { %2574 = vrcp.f32 %v1259_v38 }
 0x519   :  { %v2573_v40 = vpop.eup %2572 }
 0x51a   :  { %v1334_v42 = vmul.f32 %v2573_v40, %v1329_v39  ;;  %v2575_v44 = vpop.eup %2574 }
 0x51b   :  { %v1337_v45 = vsub.f32 1.0, %v2575_v44  ;;  %v1339_v48 = vmul.f32 %v2575_v44, %v1098_v21 }
 0x51c   :  { %v1335_v43 = vadd.f32 %v1334_v42, %v1333_v41 }
 0x51e   :  { %2576 = vtanh.f32 %v1335_v43 }
 0x52b   :  { %v2577_v46 = vpop.eup %2576 }
 0x52c   :  { %v1338_v47 = vmul.f32 %v2577_v46, %v1337_v45  ;;  %v1828_v46 = vld [vmem:[#allocation3 + $0xe] sm:$0x3] }
 0x52e   :  { %v1340_v49 = vadd.f32 %v1339_v48, %v1338_v47 }
 0x530   :  { %2425 = vmatmul.mubr.msk.f32.vlgmr.msra.gmra.mxu1 %vm136_vm2, %v1340_v49  ;;  %1342 = vst.msk [vmem:[#allocation14 + $0x8] sm:$0x3] %vm113_vm0, %v1340_v49  ;;  %2436 = vmatmul.mubr.msk.f32.vlgmr.msra.gmra.mxu0 %vm136_vm2, %v1340_v49 }
 0x531   :  { %2439 = vmatpush3.msra.mxu1 %v2886_v10  ;;  %2446 = vmatprep.mubr.msk.f32.mxu1 %vm2769_vm1, %v2768_v0 }
 0x532   :  { %2440 = vmatprep.subr.mxu1 %v2768_v0  ;;  %2450 = vmatpush3.msra.mxu0 %v2855_v1 }
 0x533   :  { %2441 = vmatpush3.msra.mxu1 %v2894_v11  ;;  %2451 = vmatprep.subr.mxu0 %v2768_v0 }
 0x534   :  { %2442 = vmatprep.subr.mxu1 %v2768_v0  ;;  %2452 = vmatpush3.msra.mxu0 %v2857_v2 }
 0x535   :  { %2443 = vmatpush3.msra.mxu1 %v2900_v12  ;;  %2453 = vmatprep.subr.mxu0 %v2768_v0 }
 0x536   :  { %2444 = vmatprep.subr.mxu1 %v2768_v0  ;;  %2454 = vmatpush3.msra.mxu0 %v2863_v4 }
 0x537   :  { %2445 = vmatpush3.msra.mxu1 %v2906_v13  ;;  %2455 = vmatprep.subr.mxu0 %v2768_v0 }
 0x538   :  { %2447 = vmatmul.mubr.msk.f32.vlgmr.msra.gmra.mxu1 %vm136_vm2, %v1340_v49  ;;  %2460 = vmatprep.subr.mxu1 %v2768_v0 }
 0x539   :  { %2461 = vmatpush3.msra.mxu1 %v2860_v3  ;;  %2456 = vmatpush3.msra.mxu0 %v2873_v7 }
 0x53a   :  { %2462 = vmatprep.subr.mxu1 %v2768_v0  ;;  %2457 = vmatprep.mubr.msk.f32.mxu0 %vm2769_vm1, %v2768_v0 }
 0x53b   :  { %2463 = vmatpush3.msra.mxu1 %v2866_v5  ;;  %2468 = vmatprep.mubr.msk.f32.mxu1 %vm2769_vm1, %v2768_v0 }
 0x53c   :  { %2464 = vmatprep.subr.mxu1 %v2768_v0  ;;  %2471 = vmatprep.subr.mxu0 %v2768_v0 }
 0x53d   :  { %2465 = vmatpush3.msra.mxu1 %v2870_v6 }
 0x53e   :  { %2466 = vmatprep.subr.mxu1 %v2768_v0 }
 0x53f   :  { %2467 = vmatpush3.msra.mxu1 %v2880_v9 }
 0x540   :  { %2482 = vmatprep.subr.mxu1 %v2768_v0 }
 0x5f0   :  { %v1414_v51 = vpop.f32.mrf.mxu1  ;;  %v1487_v52 = vpop.f32.mrf.mxu0 }
 0x5f1   :  { %v1418_v53 = vadd.f32 %v1414_v51, %v1344_v50  ;;  %v1491_v58 = vadd.f32 %v1487_v52, %v1420_v57  ;;  %v1904_v52 = vld [vmem:[#allocation6 + $0xe] sm:$0x3] }
 0x5f2   :  { %v2426_v54 = vpop.f32.mrf.mxu1  ;;  %v2437_v55 = vpop.f32.mrf.mxu0 }
 0x5f3   :  { %v2118_v56 = vmul.f32 -1.442695, %v1418_v53  ;;  %v2119_v61 = vmul.f32 -1.442695, %v1491_v58 }
 0x5f5   :  { %2578 = vpow2.f32 %v2118_v56 }
 0x5f6   :  { %2580 = vpow2.f32 %v2119_v61 }
 0x5f8   :  { %v1570_v59 = vpop.f32.mrf.mxu1 }
 0x5f9   :  { %v1571_v15 = vadd.f32 %v2936_v29, %v1570_v59  ;;  %v2059_v59 = vld [vmem:[#allocation8 + $0xe] sm:$0x3] }
 0x5fa   :  { %v2448_v60 = vpop.f32.mrf.mxu1 }
 0x602   :  { %v2579_v62 = vpop.eup %2578 }
 0x603   :  { %v1495_v63 = vadd.f32 1.0, %v2579_v62  ;;  %v2581_v8 = vpop.eup %2580 }
 0x604   :  { %v1501_v14 = vadd.f32 1.0, %v2581_v8 }
 0x605   :  { %2582 = vrcp.f32 %v1495_v63 }
 0x606   :  { %2584 = vrcp.f32 %v1501_v14 }
 0x612   :  { %v2583_v16 = vpop.eup %2582 }
 0x613   :  { %v1576_v18 = vmul.f32 %v2583_v16, %v1571_v15  ;;  %v2585_v20 = vpop.eup %2584 }
 0x614   :  { %v1579_v21 = vsub.f32 1.0, %v2585_v20  ;;  %v1581_v24 = vmul.f32 %v2585_v20, %v1340_v49 }
 0x615   :  { %v1577_v19 = vadd.f32 %v1576_v18, %v1575_v17 }
 0x617   :  { %2586 = vtanh.f32 %v1577_v19 }
 0x624   :  { %v2587_v22 = vpop.eup %2586 }
 0x625   :  { %v1580_v23 = vmul.f32 %v2587_v22, %v1579_v21 }
 0x627   :  { %v1582_v25 = vadd.f32 %v1581_v24, %v1580_v23 }
 0x629   :  { %2458 = vmatmul.mubr.msk.f32.vlgmr.msra.gmra.mxu0 %vm136_vm2, %v1582_v25  ;;  %1584 = vst.msk [vmem:[#allocation14 + $0xa] sm:$0x3] %vm113_vm0, %v1582_v25  ;;  %2469 = vmatmul.mubr.msk.f32.vlgmr.msra.gmra.mxu1 %vm136_vm2, %v1582_v25 }
 0x62a   :  { %2472 = vmatpush3.msra.mxu0 %v2886_v10  ;;  %2479 = vmatprep.mubr.msk.f32.mxu0 %vm2769_vm1, %v2768_v0 }
 0x62b   :  { %2473 = vmatprep.subr.mxu0 %v2768_v0  ;;  %2483 = vmatpush3.msra.mxu1 %v2855_v1  ;;  %v1586_v1 = vld [vmem:[#allocation3 + $0xc] sm:$0x3] }
 0x62c   :  { %2474 = vmatpush3.msra.mxu0 %v2894_v11  ;;  %2484 = vmatprep.subr.mxu1 %v2768_v0 }
 0x62d   :  { %2475 = vmatprep.subr.mxu0 %v2768_v0  ;;  %2485 = vmatpush3.msra.mxu1 %v2857_v2 }
 0x62e   :  { %2476 = vmatpush3.msra.mxu0 %v2900_v12  ;;  %2486 = vmatprep.subr.mxu1 %v2768_v0 }
 0x62f   :  { %2477 = vmatprep.subr.mxu0 %v2768_v0  ;;  %2487 = vmatpush3.msra.mxu1 %v2863_v4 }
 0x630   :  { %2478 = vmatpush3.msra.mxu0 %v2906_v13  ;;  %2488 = vmatprep.subr.mxu1 %v2768_v0 }
 0x631   :  { %2480 = vmatmul.mubr.msk.f32.vlgmr.msra.gmra.mxu0 %vm136_vm2, %v1582_v25  ;;  %2493 = vmatprep.subr.mxu0 %v2768_v0 }
 0x632   :  { %2494 = vmatpush3.msra.mxu0 %v2860_v3  ;;  %2489 = vmatpush3.msra.mxu1 %v2873_v7 }
 0x633   :  { %2495 = vmatprep.subr.mxu0 %v2768_v0  ;;  %2490 = vmatprep.mubr.msk.f32.mxu1 %vm2769_vm1, %v2768_v0 }
 0x634   :  { %2496 = vmatpush3.msra.mxu0 %v2866_v5  ;;  %2501 = vmatprep.mubr.msk.f32.mxu0 %vm2769_vm1, %v2768_v0 }
 0x635   :  { %2497 = vmatprep.subr.mxu0 %v2768_v0  ;;  %2504 = vmatprep.subr.mxu1 %v2768_v0 }
 0x636   :  { %2498 = vmatpush3.msra.mxu0 %v2870_v6 }
 0x637   :  { %2499 = vmatprep.subr.mxu0 %v2768_v0 }
 0x638   :  { %2500 = vmatpush3.msra.mxu0 %v2880_v9 }
 0x6e9   :  { %v1656_v2 = vpop.f32.mrf.mxu0  ;;  %v1729_v3 = vpop.f32.mrf.mxu1 }
 0x6ea   :  { %v1660_v4 = vadd.f32 %v1656_v2, %v1586_v1  ;;  %v1733_v28 = vadd.f32 %v1729_v3, %v1662_v27 }
 0x6eb   :  { %v2459_v7 = vpop.f32.mrf.mxu0  ;;  %v2470_v26 = vpop.f32.mrf.mxu1 }
 0x6ec   :  { %v2123_v5 = vmul.f32 -1.442695, %v1660_v4  ;;  %v2124_v32 = vmul.f32 -1.442695, %v1733_v28 }
 0x6ee   :  { %2588 = vpow2.f32 %v2123_v5 }
 0x6ef   :  { %2590 = vpow2.f32 %v2124_v32 }
 0x6f1   :  { %v1812_v30 = vpop.f32.mrf.mxu0 }
 0x6f2   :  { %v1813_v9 = vadd.f32 %v2936_v29, %v1812_v30 }
 0x6f3   :  { %v2481_v31 = vpop.f32.mrf.mxu0 }
 0x6fb   :  { %v2589_v33 = vpop.eup %2588 }
 0x6fc   :  { %v1737_v6 = vadd.f32 1.0, %v2589_v33  ;;  %v2591_v34 = vpop.eup %2590 }
 0x6fd   :  { %v1743_v35 = vadd.f32 1.0, %v2591_v34 }
 0x6fe   :  { %2592 = vrcp.f32 %v1737_v6 }
 0x6ff   :  { %2594 = vrcp.f32 %v1743_v35 }
 0x70b   :  { %v2593_v36 = vpop.eup %2592 }
 0x70c   :  { %v1818_v38 = vmul.f32 %v2593_v36, %v1813_v9  ;;  %v2595_v40 = vpop.eup %2594 }
 0x70d   :  { %v1821_v41 = vsub.f32 1.0, %v2595_v40  ;;  %v1823_v44 = vmul.f32 %v2595_v40, %v1582_v25 }
 0x70e   :  { %v1819_v39 = vadd.f32 %v1818_v38, %v1817_v37 }
 0x710   :  { %2596 = vtanh.f32 %v1819_v39 }
 0x71d   :  { %v2597_v42 = vpop.eup %2596 }
 0x71e   :  { %v1822_v43 = vmul.f32 %v2597_v42, %v1821_v41 }
 0x720   :  { %v1824_v45 = vadd.f32 %v1823_v44, %v1822_v43 }
 0x722   :  { %2491 = vmatmul.mubr.msk.f32.vlgmr.msra.gmra.mxu1 %vm136_vm2, %v1824_v45  ;;  %1826 = vst.msk [vmem:[#allocation14 + $0xc] sm:$0x3] %vm113_vm0, %v1824_v45  ;;  %2502 = vmatmul.mubr.msk.f32.vlgmr.msra.gmra.mxu0 %vm136_vm2, %v1824_v45 }
 0x723   :  { %2505 = vmatpush3.msra.mxu1 %v2886_v10  ;;  %2512 = vmatprep.mubr.msk.f32.mxu1 %vm2769_vm1, %v2768_v0 }
 0x724   :  { %2506 = vmatprep.subr.mxu1 %v2768_v0 }
 0x725   :  { %2507 = vmatpush3.msra.mxu1 %v2894_v11 }
 0x726   :  { %2508 = vmatprep.subr.mxu1 %v2768_v0 }
 0x727   :  { %2509 = vmatpush3.msra.mxu1 %v2900_v12 }
 0x728   :  { %2510 = vmatprep.subr.mxu1 %v2768_v0 }
 0x729   :  { %2511 = vmatpush3.msra.mxu1 %v2906_v13 }
 0x72a   :  { %2513 = vmatmul.mubr.msk.f32.vlgmr.msra.gmra.mxu1 %vm136_vm2, %v1824_v45 }
 0x7e2   :  { %v1898_v47 = vpop.f32.mrf.mxu1  ;;  %v1971_v10 = vpop.f32.mrf.mxu0 }
 0x7e3   :  { %v1902_v48 = vadd.f32 %v1898_v47, %v1828_v46  ;;  %v1975_v11 = vadd.f32 %v1971_v10, %v1904_v52 }
 0x7e4   :  { %v2492_v49 = vpop.f32.mrf.mxu1  ;;  %v2503_v50 = vpop.f32.mrf.mxu0 }
 0x7e5   :  { %v2128_v51 = vmul.f32 -1.442695, %v1902_v48  ;;  %v2129_v55 = vmul.f32 -1.442695, %v1975_v11 }
 0x7e7   :  { %2598 = vpow2.f32 %v2128_v51 }
 0x7e8   :  { %2600 = vpow2.f32 %v2129_v55 }
 0x7ea   :  { %v2054_v53 = vpop.f32.mrf.mxu1 }
 0x7eb   :  { %v2055_v57 = vadd.f32 %v2936_v29, %v2054_v53 }
 0x7ec   :  { %v2514_v54 = vpop.f32.mrf.mxu1 }
 0x7f4   :  { %v2599_v12 = vpop.eup %2598 }
 0x7f5   :  { %v1979_v0 = vadd.f32 1.0, %v2599_v12  ;;  %v2601_v13 = vpop.eup %2600 }
 0x7f6   :  { %v1985_v56 = vadd.f32 1.0, %v2601_v13 }
 0x7f7   :  { %2602 = vrcp.f32 %v1979_v0 }
 0x7f8   :  { %2604 = vrcp.f32 %v1985_v56 }
 0x804   :  { %v2603_v58 = vpop.eup %2602 }
 0x805   :  { %v2060_v60 = vmul.f32 %v2603_v58, %v2055_v57  ;;  %v2605_v62 = vpop.eup %2604 }
 0x806   :  { %v2063_v63 = vsub.f32 1.0, %v2605_v62  ;;  %v2065_v14 = vmul.f32 %v2605_v62, %v1824_v45 }
 0x807   :  { %v2061_v61 = vadd.f32 %v2060_v60, %v2059_v59 }
 0x809   :  { %2606 = vtanh.f32 %v2061_v61 }
 0x816   :  { %v2607_v8 = vpop.eup %2606 }
 0x817   :  { %v2064_v15 = vmul.f32 %v2607_v8, %v2063_v63 }
 0x819   :  { %v2066_v16 = vadd.f32 %v2065_v14, %v2064_v15 }
 0x81b   :  { %2069 = vst.msk [vmem:[#allocation2] sm:$0x3] %vm113_vm0, %v2066_v16  ;;  %2068 = vst.msk [vmem:[#allocation14 + $0xe] sm:$0x3] %vm113_vm0, %v2066_v16 }
 0x81c   :  { %2739 = shalt.err (!%p2736_p6)
}
 0x81d   :  { %2081 = dma.vmem_to_hbm [thread:$0]  %s2076_s10, 256, %s3178_s7, [#allocation5], %s2760_s29, %s2760_s29, %s2761_s30  }
 0x81e   :  { %2756 = dma.done.wait [#allocation5], 256  }
 0x81f   :  { %2757 = vsyncadd [#allocation5], 4294967040 }
 0x820   :  { %2085 = vsyncpa [#allocation4], 1 }
 0x821   :  { %2086 = vsyncpa [#allocation7], 1 }
 0x822   :  { %2087 = vsyncpa [#allocation10], 1 }
 0x823   :  { %2088 = vsyncpa [#allocation13], 1 }
 0x824   :  { %2089 = vsyncpa [#allocation5], 1 }

</bundles_post_ra>
